<compile_context>
chip_gen: v7x
topology: tpu7x:2x2x1
jax: 0.10.0
libtpu: 0.0.40
codegen_flags: <defaults>
</compile_context>

<pallas_src>
import functools
import math

import jax
import jax.numpy as jnp
from jax.experimental import pallas as pl
from jax.experimental.pallas import tpu as pltpu

H_IN = 90          # real feature width of the reference module (H_0..H_3)
FC_HIDDEN = 32     # real fc1 width
HP = 128           # padded feature width (lane-aligned)
FCP = 128          # padded fc1 width
TILE_MAX = 512     # A-tile edge; ~2.5 MiB VMEM at 512, safe on v5e/v6e/v7x


def _round_up(x, m):
    return ((x + m - 1) // m) * m


# --------------------------------------------------------------------------- #
# SAGEConv(mean) layer (layers 1 & 2):
#   tiled  acc (+)= A01_tile @ h_tile ; epilogue: f32 1/deg scale,
#   [agg | h_self] @ [W_l; W_r] + b, relu
# --------------------------------------------------------------------------- #
def _sage_layer_kernel(a_ref, h_ref, hs_ref, invdeg_ref, w_ref, b_ref,
                       out_ref, acc_ref):
    k = pl.program_id(1)

    prod = jnp.dot(a_ref[...], h_ref[...], preferred_element_type=jnp.float32)

    @pl.when(k == 0)
    def _():
        acc_ref[...] = prod            # write first product directly (no zero pass)

    @pl.when(k != 0)
    def _():
        acc_ref[...] += prod

    @pl.when(k == pl.num_programs(1) - 1)
    def _():
        # mean aggregation: exact 0/1 counts scaled by f32 1/deg in the epilogue
        agg = (acc_ref[...] * invdeg_ref[...]).astype(jnp.bfloat16)    # (tile, HP)
        cat = jnp.concatenate([agg, hs_ref[...]], axis=1)              # (tile, 2*HP)
        out = jnp.dot(cat, w_ref[...],
                      preferred_element_type=jnp.float32) + b_ref[...]
        out_ref[...] = jnp.maximum(out, 0.0).astype(out_ref.dtype)     # relu


def _sage_layer(adj01, h, inv_deg, w, b, *, tile):
    n_pad = h.shape[0]
    grid = (n_pad // tile, n_pad // tile)
    return pl.pallas_call(
        _sage_layer_kernel,
        out_shape=jax.ShapeDtypeStruct((n_pad, HP), jnp.bfloat16),
        grid_spec=pltpu.PrefetchScalarGridSpec(
            num_scalar_prefetch=0,
            grid=grid,
            in_specs=[
                pl.BlockSpec((tile, tile), lambda i, k: (i, k)),   # A (0/1, bf16)
                pl.BlockSpec((tile, HP), lambda i, k: (k, 0)),     # neighbour feats
                pl.BlockSpec((tile, HP), lambda i, k: (i, 0)),     # self (root) feats
                pl.BlockSpec((tile, 1), lambda i, k: (i, 0)),      # 1/deg (f32)
                pl.BlockSpec((2 * HP, HP), lambda i, k: (0, 0)),   # [W_l; W_r]
                pl.BlockSpec((1, HP), lambda i, k: (0, 0)),        # bias (f32)
            ],
            out_specs=pl.BlockSpec((tile, HP), lambda i, k: (i, 0)),
            scratch_shapes=[pltpu.VMEM((tile, HP), jnp.float32)],
        ),
        compiler_params=pltpu.CompilerParams(
            dimension_semantics=("parallel", "arbitrary")),
    )(adj01, h, h, inv_deg, w, b)


# --------------------------------------------------------------------------- #
# Layer 3 fused with the head:
#   per row tile: same SAGE epilogue producing the h3 tile; that tile is
#   immediately pool-accumulated into a (b_pad, HP) f32 scratch.  At the final
#   grid step: f32 1/count scale, fc1 + relu, fc2 -> lane-dense (b_pad, HP) slab.
# --------------------------------------------------------------------------- #
def _sage_head_kernel(a_ref, h_ref, hs_ref, invdeg_ref, w_ref, b_ref,
                      pool_ref, invcnt_ref, wf1_ref, bf1_ref, wf2_ref, bf2_ref,
                      out_ref, acc_ref, pacc_ref):
    i = pl.program_id(0)
    k = pl.program_id(1)
    last_i = pl.num_programs(0) - 1
    last_k = pl.num_programs(1) - 1

    prod = jnp.dot(a_ref[...], h_ref[...], preferred_element_type=jnp.float32)

    @pl.when(k == 0)
    def _():
        acc_ref[...] = prod

    @pl.when(k != 0)
    def _():
        acc_ref[...] += prod

    @pl.when(k == last_k)
    def _():
        agg = (acc_ref[...] * invdeg_ref[...]).astype(jnp.bfloat16)    # (tile, HP)
        cat = jnp.concatenate([agg, hs_ref[...]], axis=1)              # (tile, 2*HP)
        h3 = jnp.maximum(
            jnp.dot(cat, w_ref[...], preferred_element_type=jnp.float32)
            + b_ref[...],
            0.0,
        )                                                              # f32 (tile, HP)

        # global_mean_pool partial sum for this row tile (pool is 0/1 one-hot)
        contrib = jnp.dot(pool_ref[...], h3.astype(jnp.bfloat16),
                          preferred_element_type=jnp.float32)          # (b_pad, HP)

        @pl.when(i == 0)
        def _():
            pacc_ref[...] = contrib

        @pl.when(i != 0)
        def _():
            pacc_ref[...] += contrib

        @pl.when(i == last_i)
        def _():
            pooled = (pacc_ref[...] * invcnt_ref[...]).astype(jnp.bfloat16)
            h4 = jnp.maximum(
                jnp.dot(pooled, wf1_ref[...],
                        preferred_element_type=jnp.float32) + bf1_ref[...],
                0.0,
            )                                                          # (b_pad, FCP)
            out_ref[...] = (
                jnp.dot(h4.astype(jnp.bfloat16), wf2_ref[...],
                        preferred_element_type=jnp.float32)
                + bf2_ref[...]
            )                                                          # col 0 real


def _sage_head_layer(adj01, h, inv_deg, w, b, pool01, inv_cnt,
                     wf1, bf1, wf2, bf2, *, tile, b_pad):
    n_pad = h.shape[0]
    grid = (n_pad // tile, n_pad // tile)
    # TODO(synk): for very large b_pad add a batch grid axis on the head part so
    # the (b_pad, tile) pool tiles / (b_pad, HP) accumulator stay VMEM-bounded.
    return pl.pallas_call(
        _sage_head_kernel,
        out_shape=jax.ShapeDtypeStruct((b_pad, HP), jnp.float32),
        grid_spec=pltpu.PrefetchScalarGridSpec(
            num_scalar_prefetch=0,
            grid=grid,
            in_specs=[
                pl.BlockSpec((tile, tile), lambda i, k: (i, k)),   # A (0/1, bf16)
                pl.BlockSpec((tile, HP), lambda i, k: (k, 0)),     # neighbour feats
                pl.BlockSpec((tile, HP), lambda i, k: (i, 0)),     # self feats
                pl.BlockSpec((tile, 1), lambda i, k: (i, 0)),      # 1/deg (f32)
                pl.BlockSpec((2 * HP, HP), lambda i, k: (0, 0)),   # [W_l; W_r]
                pl.BlockSpec((1, HP), lambda i, k: (0, 0)),        # conv bias
                pl.BlockSpec((b_pad, tile), lambda i, k: (0, i)),  # pool (0/1, bf16)
                pl.BlockSpec((b_pad, 1), lambda i, k: (0, 0)),     # 1/count (f32)
                pl.BlockSpec((HP, FCP), lambda i, k: (0, 0)),      # fc1 weight
                pl.BlockSpec((1, FCP), lambda i, k: (0, 0)),       # fc1 bias
                pl.BlockSpec((FCP, HP), lambda i, k: (0, 0)),      # fc2 weight (col 0)
                pl.BlockSpec((1, HP), lambda i, k: (0, 0)),        # fc2 bias (col 0)
            ],
            out_specs=pl.BlockSpec((b_pad, HP), lambda i, k: (0, 0)),
            scratch_shapes=[
                pltpu.VMEM((tile, HP), jnp.float32),    # A@h accumulator
                pltpu.VMEM((b_pad, HP), jnp.float32),   # pooled accumulator
            ],
        ),
        # Both axes "arbitrary": the pooled accumulator & output are carried
        # across the row-tile axis as well (cost accepted for the fusion win).
        compiler_params=pltpu.CompilerParams(
            dimension_semantics=("arbitrary", "arbitrary")),
    )(adj01, h, h, inv_deg, w, b, pool01, inv_cnt, wf1, bf1, wf2, bf2)


# --------------------------------------------------------------------------- #
# JAX wrapper (jit-able; n_graphs is static -> no device->host sync)
# --------------------------------------------------------------------------- #
@functools.partial(jax.jit, static_argnames=("n_graphs",))
def graphsage_forward(x, edge_index, batch, params, *, n_graphs):
    n_nodes = x.shape[0]
    n_pad0 = _round_up(max(n_nodes, 128), 128)
    tile = min(TILE_MAX, n_pad0)          # 512-edge tiles everywhere (v5e/v6e/v7x)
    n_pad = _round_up(n_pad0, tile)
    b_pad = _round_up(max(n_graphs, 8), 8)

    src = edge_index[0]
    dst = edge_index[1]

    # Exact 0/1 (edge-multiplicity) adjacency; mean normalization (1/deg) is
    # applied in f32 inside the kernel epilogue.  Columns of padded nodes are
    # exactly zero -> padded rows never contaminate real outputs.
    adj01 = jnp.zeros((n_pad, n_pad), jnp.float32).at[dst, src].add(1.0)
    deg = jnp.zeros((n_pad,), jnp.float32).at[dst].add(1.0)
    inv_deg = (1.0 / jnp.maximum(deg, 1.0))[:, None]            # (n_pad, 1) f32
    adj01 = adj01.astype(jnp.bfloat16)                          # small ints exact

    # zero-pad node features to (n_pad, 128) bf16
    xp = jnp.zeros((n_pad, HP), jnp.bfloat16)
    xp = xp.at[:n_nodes, :H_IN].set(x.astype(jnp.bfloat16))

    # global_mean_pool: 0/1 one-hot matrix (bf16) + f32 1/count scaling in-kernel
    one_hot = (batch[None, :] == jnp.arange(n_graphs)[:, None]).astype(jnp.float32)
    counts = one_hot.sum(axis=1)                                # (n_graphs,)
    pool01 = jnp.zeros((b_pad, n_pad), jnp.float32)
    pool01 = pool01.at[:n_graphs, :n_nodes].set(one_hot).astype(jnp.bfloat16)
    inv_cnt = jnp.zeros((b_pad, 1), jnp.float32)
    inv_cnt = inv_cnt.at[:n_graphs, 0].set(1.0 / jnp.maximum(counts, 1.0))

    h1 = _sage_layer(adj01, xp, inv_deg, params["w1"], params["b1"], tile=tile)
    h2 = _sage_layer(adj01, h1, inv_deg, params["w2"], params["b2"], tile=tile)
    out_wide = _sage_head_layer(
        adj01, h2, inv_deg, params["w3"], params["b3"],
        pool01, inv_cnt,
        params["wf1"], params["bf1"], params["wf2"], params["bf2"],
        tile=tile, b_pad=b_pad,
    )
    return out_wide[:n_graphs, :1]


# --------------------------------------------------------------------------- #
# Parameters: SAGE weights stored pre-concatenated as [W_l; W_r] (2*HP, HP),
# fc weights pre-transposed (in, out), all zero-padded to 128 and cast to bf16.
# Biases stay f32.
# --------------------------------------------------------------------------- #
def _kaiming_uniform(key, fan_in, shape):
    # matches the module's explicit kaiming_uniform_(nonlinearity='relu'):
    # bound = sqrt(2) * sqrt(3 / fan_in); biases are zero-initialized.
    bound = math.sqrt(6.0 / fan_in)
    return jax.random.uniform(key, shape, jnp.float32, -bound, bound)


def init_params(key):
    ks = jax.random.split(key, 8)

    def conv_weight(k_l, k_r):
        wl = _kaiming_uniform(k_l, H_IN, (H_IN, H_IN))   # applied to mean-aggregated
        wr = _kaiming_uniform(k_r, H_IN, (H_IN, H_IN))   # applied to root/self
        w = jnp.zeros((2 * HP, HP), jnp.float32)
        w = w.at[:H_IN, :H_IN].set(wl)
        w = w.at[HP:HP + H_IN, :H_IN].set(wr)
        return w.astype(jnp.bfloat16)

    def pad_cast(w, rows, cols):
        out = jnp.zeros((rows, cols), jnp.float32)
        return out.at[:w.shape[0], :w.shape[1]].set(w).astype(jnp.bfloat16)

    return {
        "w1": conv_weight(ks[0], ks[1]),
        "b1": jnp.zeros((1, HP), jnp.float32),
        "w2": conv_weight(ks[2], ks[3]),
        "b2": jnp.zeros((1, HP), jnp.float32),
        "w3": conv_weight(ks[4], ks[5]),
        "b3": jnp.zeros((1, HP), jnp.float32),
        "wf1": pad_cast(_kaiming_uniform(ks[6], H_IN, (H_IN, FC_HIDDEN)), HP, FCP),
        "bf1": jnp.zeros((1, FCP), jnp.float32),
        "wf2": pad_cast(_kaiming_uniform(ks[7], FC_HIDDEN, (FC_HIDDEN, 1)), FCP, HP),
        "bf2": jnp.zeros((1, HP), jnp.float32),
    }


if __name__ == "__main__":
    key = jax.random.PRNGKey(0)
    k_x, k_e, k_a = jax.random.split(key, 3)

    # Small synthetic batch of 2 graphs, 8 nodes each (16 nodes total), 40 edges.
    n_nodes, n_edges, n_graphs = 16, 40, 2
    x = jax.random.normal(k_x, (n_nodes, H_IN), jnp.float32)

    # Keep edges within each graph (nodes 0-7 -> graph 0, 8-15 -> graph 1).
    ke1, ke2 = jax.random.split(k_e)
    src0 = jax.random.randint(ke1, (n_edges // 2,), 0, 8)
    dst0 = jax.random.randint(ke2, (n_edges // 2,), 0, 8)
    edge_index = jnp.stack(
        [jnp.concatenate([src0, src0 + 8]), jnp.concatenate([dst0, dst0 + 8])], axis=0
    ).astype(jnp.int32)

    # edge_attr exists in the data object but is unused by the reference forward.
    edge_attr = jax.random.normal(k_a, (n_edges, 1), jnp.float32)  # unused

    batch = jnp.concatenate(
        [jnp.zeros((8,), jnp.int32), jnp.ones((8,), jnp.int32)]
    )

    params = init_params(jax.random.PRNGKey(42))

    out = graphsage_forward(x, edge_index, batch, params, n_graphs=n_graphs)
    jax.block_until_ready(out)
    assert out.shape == (n_graphs, 1)
    print("KERNEL_OK")
</pallas_src>

<mosaic_0001>
module attributes {stable_mosaic.version = 11 : i64} {
  func.func @_sage_layer_kernel(%arg0: i32, %arg1: i32, %arg2: memref<128x128xbf16, #tpu.memory_space<vmem>>, %arg3: memref<128x128xbf16, #tpu.memory_space<vmem>>, %arg4: memref<128x128xbf16, #tpu.memory_space<vmem>>, %arg5: memref<128x1xf32, #tpu.memory_space<vmem>>, %arg6: memref<256x128xbf16, #tpu.memory_space<vmem>>, %arg7: memref<1x128xf32, #tpu.memory_space<vmem>>, %arg8: memref<128x128xbf16, #tpu.memory_space<vmem>>, %arg9: memref<128x128xf32, #tpu.memory_space<vmem>>) attributes {dimension_semantics = [#tpu.dimension_semantics<parallel>, #tpu.dimension_semantics<arbitrary>], iteration_bounds = array<i64: 1, 1>, scalar_prefetch = 0 : i64, scratch_operands = 1 : i64, tpu.core_type = #tpu.core_type<tc>, window_params = [{transform_indices = @transform_0, window_bounds = array<i64: 128, 128>}, {transform_indices = @transform_1, window_bounds = array<i64: 128, 128>}, {transform_indices = @transform_2, window_bounds = array<i64: 128, 128>}, {transform_indices = @transform_3, window_bounds = array<i64: 128, 1>}, {pipeline_mode = #tpu.pipeline_mode<synchronous>, transform_indices = @transform_4, window_bounds = array<i64: 256, 128>}, {pipeline_mode = #tpu.pipeline_mode<synchronous>, transform_indices = @transform_5, window_bounds = array<i64: 1, 128>}, {transform_indices = @transform_6, window_bounds = array<i64: 128, 128>}]} {
    %c0 = arith.constant 0 : index
    %c0_0 = arith.constant 0 : index
    %0 = vector.load %arg2[%c0, %c0_0] : memref<128x128xbf16, #tpu.memory_space<vmem>>, vector<128x128xbf16>
    %c0_1 = arith.constant 0 : index
    %c0_2 = arith.constant 0 : index
    %1 = vector.load %arg3[%c0_1, %c0_2] : memref<128x128xbf16, #tpu.memory_space<vmem>>, vector<128x128xbf16>
    %cst = arith.constant dense<0.000000e+00> : vector<128x128xf32>
    %2 = tpu.matmul %0, %1, %cst {dimension_numbers = #tpu.dot_dimension_numbers<[1], [0], [0], [1], [0, 0, 1, 1], [], []>} : vector<128x128xbf16>, vector<128x128xbf16>, vector<128x128xf32> -> vector<128x128xf32>
    %c0_i32 = arith.constant 0 : i32
    %3 = arith.cmpi eq, %arg1, %c0_i32 : i32
    %4 = arith.extui %3 : i1 to i32
    %c0_i32_3 = arith.constant 0 : i32
    %5 = arith.cmpi ne, %4, %c0_i32_3 : i32
    scf.if %5 {
      %c0_8 = arith.constant 0 : index
      %c0_9 = arith.constant 0 : index
      %12 = vector.load %arg9[%c0_8, %c0_9] : memref<128x128xf32, #tpu.memory_space<vmem>>, vector<128x128xf32>
      tpu.vector_store %arg9[%c0_8, %c0_9], %2 {strides = array<i32>} : memref<128x128xf32, #tpu.memory_space<vmem>>, vector<128x128xf32>,
    } else {
    }
    %c0_i32_4 = arith.constant 0 : i32
    %6 = arith.cmpi ne, %arg1, %c0_i32_4 : i32
    %7 = arith.extui %6 : i1 to i32
    %c0_i32_5 = arith.constant 0 : i32
    %8 = arith.cmpi ne, %7, %c0_i32_5 : i32
    scf.if %8 {
      %c0_8 = arith.constant 0 : index
      %c0_9 = arith.constant 0 : index
      %12 = vector.load %arg9[%c0_8, %c0_9] : memref<128x128xf32, #tpu.memory_space<vmem>>, vector<128x128xf32>
      %13 = arith.addf %12, %2 : vector<128x128xf32>
      %c0_10 = arith.constant 0 : index
      %c0_11 = arith.constant 0 : index
      %14 = vector.load %arg9[%c0_10, %c0_11] : memref<128x128xf32, #tpu.memory_space<vmem>>, vector<128x128xf32>
      tpu.vector_store %arg9[%c0_10, %c0_11], %13 {strides = array<i32>} : memref<128x128xf32, #tpu.memory_space<vmem>>, vector<128x128xf32>,
    } else {
    }
    %c0_i32_6 = arith.constant 0 : i32
    %9 = arith.cmpi eq, %arg1, %c0_i32_6 : i32
    %10 = arith.extui %9 : i1 to i32
    %c0_i32_7 = arith.constant 0 : i32
    %11 = arith.cmpi ne, %10, %c0_i32_7 : i32
    scf.if %11 {
      %c0_8 = arith.constant 0 : index
      %c0_9 = arith.constant 0 : index
      %12 = vector.load %arg9[%c0_8, %c0_9] : memref<128x128xf32, #tpu.memory_space<vmem>>, vector<128x128xf32>
      %c0_10 = arith.constant 0 : index
      %c0_11 = arith.constant 0 : index
      %13 = vector.load %arg5[%c0_10, %c0_11] : memref<128x1xf32, #tpu.memory_space<vmem>>, vector<128x1xf32>
      %14 = vector.broadcast %13 : vector<128x1xf32> to vector<128x128xf32>
      %15 = arith.mulf %12, %14 : vector<128x128xf32>
      %16 = arith.truncf %15 : vector<128x128xf32> to vector<128x128xbf16>
      %c0_12 = arith.constant 0 : index
      %c0_13 = arith.constant 0 : index
      %17 = vector.load %arg4[%c0_12, %c0_13] : memref<128x128xbf16, #tpu.memory_space<vmem>>, vector<128x128xbf16>
      %18 = tpu.concatenate %16, %17 in 1 : vector<128x128xbf16>, vector<128x128xbf16> -> vector<128x256xbf16>
      %c0_14 = arith.constant 0 : index
      %c0_15 = arith.constant 0 : index
      %19 = vector.load %arg6[%c0_14, %c0_15] : memref<256x128xbf16, #tpu.memory_space<vmem>>, vector<256x128xbf16>
      %cst_16 = arith.constant dense<0.000000e+00> : vector<128x128xf32>
      %20 = tpu.matmul %18, %19, %cst_16 {dimension_numbers = #tpu.dot_dimension_numbers<[1], [0], [0], [1], [0, 0, 1, 1], [], []>} : vector<128x256xbf16>, vector<256x128xbf16>, vector<128x128xf32> -> vector<128x128xf32>
      %c0_17 = arith.constant 0 : index
      %c0_18 = arith.constant 0 : index
      %21 = vector.load %arg7[%c0_17, %c0_18] : memref<1x128xf32, #tpu.memory_space<vmem>>, vector<1x128xf32>
      %22 = vector.broadcast %21 : vector<1x128xf32> to vector<128x128xf32>
      %23 = arith.addf %20, %22 : vector<128x128xf32>
      %cst_19 = arith.constant 0.000000e+00 : f32
      %24 = vector.broadcast %cst_19 : f32 to vector<128x128xf32>
      %25 = arith.maximumf %23, %24 : vector<128x128xf32>
      %26 = arith.truncf %25 : vector<128x128xf32> to vector<128x128xbf16>
      %c0_20 = arith.constant 0 : index
      %c0_21 = arith.constant 0 : index
      %27 = vector.load %arg8[%c0_20, %c0_21] : memref<128x128xbf16, #tpu.memory_space<vmem>>, vector<128x128xbf16>
      tpu.vector_store %arg8[%c0_20, %c0_21], %26 {strides = array<i32>} : memref<128x128xbf16, #tpu.memory_space<vmem>>, vector<128x128xbf16>,
    } else {
    }
    return
  }
  func.func @transform_0(%arg0: i32, %arg1: i32) -> (i32, i32) {
    %c0_i32 = arith.constant 0 : i32
    return %arg0, %arg1 : i32, i32
  }
  func.func @transform_1(%arg0: i32, %arg1: i32) -> (i32, i32) {
    %c0_i32 = arith.constant 0 : i32
    %c0_i32_0 = arith.constant 0 : i32
    return %arg1, %c0_i32 : i32, i32
  }
  func.func @transform_2(%arg0: i32, %arg1: i32) -> (i32, i32) {
    %c0_i32 = arith.constant 0 : i32
    %c0_i32_0 = arith.constant 0 : i32
    return %arg0, %c0_i32 : i32, i32
  }
  func.func @transform_3(%arg0: i32, %arg1: i32) -> (i32, i32) {
    %c0_i32 = arith.constant 0 : i32
    %c0_i32_0 = arith.constant 0 : i32
    return %arg0, %c0_i32 : i32, i32
  }
  func.func @transform_4(%arg0: i32, %arg1: i32) -> (i32, i32) {
    %c0_i32 = arith.constant 0 : i32
    %c0_i32_0 = arith.constant 0 : i32
    %c0_i32_1 = arith.constant 0 : i32
    return %c0_i32, %c0_i32_0 : i32, i32
  }
  func.func @transform_5(%arg0: i32, %arg1: i32) -> (i32, i32) {
    %c0_i32 = arith.constant 0 : i32
    %c0_i32_0 = arith.constant 0 : i32
    %c0_i32_1 = arith.constant 0 : i32
    return %c0_i32, %c0_i32_0 : i32, i32
  }
  func.func @transform_6(%arg0: i32, %arg1: i32) -> (i32, i32) {
    %c0_i32 = arith.constant 0 : i32
    %c0_i32_0 = arith.constant 0 : i32
    return %arg0, %c0_i32 : i32, i32
  }
}

module attributes {stable_mosaic.version = 11 : i64} {
  func.func @_sage_head_kernel(%arg0: i32, %arg1: i32, %arg2: memref<128x128xbf16, #tpu.memory_space<vmem>>, %arg3: memref<128x128xbf16, #tpu.memory_space<vmem>>, %arg4: memref<128x128xbf16, #tpu.memory_space<vmem>>, %arg5: memref<128x1xf32, #tpu.memory_space<vmem>>, %arg6: memref<256x128xbf16, #tpu.memory_space<vmem>>, %arg7: memref<1x128xf32, #tpu.memory_space<vmem>>, %arg8: memref<8x128xbf16, #tpu.memory_space<vmem>>, %arg9: memref<8x1xf32, #tpu.memory_space<vmem>>, %arg10: memref<128x128xbf16, #tpu.memory_space<vmem>>, %arg11: memref<1x128xf32, #tpu.memory_space<vmem>>, %arg12: memref<128x128xbf16, #tpu.memory_space<vmem>>, %arg13: memref<1x128xf32, #tpu.memory_space<vmem>>, %arg14: memref<8x128xf32, #tpu.memory_space<vmem>>, %arg15: memref<128x128xf32, #tpu.memory_space<vmem>>, %arg16: memref<8x128xf32, #tpu.memory_space<vmem>>) attributes {dimension_semantics = [#tpu.dimension_semantics<arbitrary>, #tpu.dimension_semantics<arbitrary>], iteration_bounds = array<i64: 1, 1>, scalar_prefetch = 0 : i64, scratch_operands = 2 : i64, tpu.core_type = #tpu.core_type<tc>, window_params = [{transform_indices = @transform_0, window_bounds = array<i64: 128, 128>}, {transform_indices = @transform_1, window_bounds = array<i64: 128, 128>}, {transform_indices = @transform_2, window_bounds = array<i64: 128, 128>}, {transform_indices = @transform_3, window_bounds = array<i64: 128, 1>}, {pipeline_mode = #tpu.pipeline_mode<synchronous>, transform_indices = @transform_4, window_bounds = array<i64: 256, 128>}, {pipeline_mode = #tpu.pipeline_mode<synchronous>, transform_indices = @transform_5, window_bounds = array<i64: 1, 128>}, {transform_indices = @transform_6, window_bounds = array<i64: 8, 128>}, {pipeline_mode = #tpu.pipeline_mode<synchronous>, transform_indices = @transform_7, window_bounds = array<i64: 8, 1>}, {pipeline_mode = #tpu.pipeline_mode<synchronous>, transform_indices = @transform_8, window_bounds = array<i64: 128, 128>}, {pipeline_mode = #tpu.pipeline_mode<synchronous>, transform_indices = @transform_9, window_bounds = array<i64: 1, 128>}, {pipeline_mode = #tpu.pipeline_mode<synchronous>, transform_indices = @transform_10, window_bounds = array<i64: 128, 128>}, {pipeline_mode = #tpu.pipeline_mode<synchronous>, transform_indices = @transform_11, window_bounds = array<i64: 1, 128>}, {pipeline_mode = #tpu.pipeline_mode<synchronous>, transform_indices = @transform_12, window_bounds = array<i64: 8, 128>}]} {
    %c0 = arith.constant 0 : index
    %c0_0 = arith.constant 0 : index
    %0 = vector.load %arg2[%c0, %c0_0] : memref<128x128xbf16, #tpu.memory_space<vmem>>, vector<128x128xbf16>
    %c0_1 = arith.constant 0 : index
    %c0_2 = arith.constant 0 : index
    %1 = vector.load %arg3[%c0_1, %c0_2] : memref<128x128xbf16, #tpu.memory_space<vmem>>, vector<128x128xbf16>
    %cst = arith.constant dense<0.000000e+00> : vector<128x128xf32>
    %2 = tpu.matmul %0, %1, %cst {dimension_numbers = #tpu.dot_dimension_numbers<[1], [0], [0], [1], [0, 0, 1, 1], [], []>} : vector<128x128xbf16>, vector<128x128xbf16>, vector<128x128xf32> -> vector<128x128xf32>
    %c0_i32 = arith.constant 0 : i32
    %3 = arith.cmpi eq, %arg1, %c0_i32 : i32
    %4 = arith.extui %3 : i1 to i32
    %c0_i32_3 = arith.constant 0 : i32
    %5 = arith.cmpi ne, %4, %c0_i32_3 : i32
    scf.if %5 {
      %c0_8 = arith.constant 0 : index
      %c0_9 = arith.constant 0 : index
      %12 = vector.load %arg15[%c0_8, %c0_9] : memref<128x128xf32, #tpu.memory_space<vmem>>, vector<128x128xf32>
      tpu.vector_store %arg15[%c0_8, %c0_9], %2 {strides = array<i32>} : memref<128x128xf32, #tpu.memory_space<vmem>>, vector<128x128xf32>,
    } else {
    }
    %c0_i32_4 = arith.constant 0 : i32
    %6 = arith.cmpi ne, %arg1, %c0_i32_4 : i32
    %7 = arith.extui %6 : i1 to i32
    %c0_i32_5 = arith.constant 0 : i32
    %8 = arith.cmpi ne, %7, %c0_i32_5 : i32
    scf.if %8 {
      %c0_8 = arith.constant 0 : index
      %c0_9 = arith.constant 0 : index
      %12 = vector.load %arg15[%c0_8, %c0_9] : memref<128x128xf32, #tpu.memory_space<vmem>>, vector<128x128xf32>
      %13 = arith.addf %12, %2 : vector<128x128xf32>
      %c0_10 = arith.constant 0 : index
      %c0_11 = arith.constant 0 : index
      %14 = vector.load %arg15[%c0_10, %c0_11] : memref<128x128xf32, #tpu.memory_space<vmem>>, vector<128x128xf32>
      tpu.vector_store %arg15[%c0_10, %c0_11], %13 {strides = array<i32>} : memref<128x128xf32, #tpu.memory_space<vmem>>, vector<128x128xf32>,
    } else {
    }
    %c0_i32_6 = arith.constant 0 : i32
    %9 = arith.cmpi eq, %arg1, %c0_i32_6 : i32
    %10 = arith.extui %9 : i1 to i32
    %c0_i32_7 = arith.constant 0 : i32
    %11 = arith.cmpi ne, %10, %c0_i32_7 : i32
    scf.if %11 {
      %c0_8 = arith.constant 0 : index
      %c0_9 = arith.constant 0 : index
      %12 = vector.load %arg15[%c0_8, %c0_9] : memref<128x128xf32, #tpu.memory_space<vmem>>, vector<128x128xf32>
      %c0_10 = arith.constant 0 : index
      %c0_11 = arith.constant 0 : index
      %13 = vector.load %arg5[%c0_10, %c0_11] : memref<128x1xf32, #tpu.memory_space<vmem>>, vector<128x1xf32>
      %14 = vector.broadcast %13 : vector<128x1xf32> to vector<128x128xf32>
      %15 = arith.mulf %12, %14 : vector<128x128xf32>
      %16 = arith.truncf %15 : vector<128x128xf32> to vector<128x128xbf16>
      %c0_12 = arith.constant 0 : index
      %c0_13 = arith.constant 0 : index
      %17 = vector.load %arg4[%c0_12, %c0_13] : memref<128x128xbf16, #tpu.memory_space<vmem>>, vector<128x128xbf16>
      %18 = tpu.concatenate %16, %17 in 1 : vector<128x128xbf16>, vector<128x128xbf16> -> vector<128x256xbf16>
      %c0_14 = arith.constant 0 : index
      %c0_15 = arith.constant 0 : index
      %19 = vector.load %arg6[%c0_14, %c0_15] : memref<256x128xbf16, #tpu.memory_space<vmem>>, vector<256x128xbf16>
      %cst_16 = arith.constant dense<0.000000e+00> : vector<128x128xf32>
      %20 = tpu.matmul %18, %19, %cst_16 {dimension_numbers = #tpu.dot_dimension_numbers<[1], [0], [0], [1], [0, 0, 1, 1], [], []>} : vector<128x256xbf16>, vector<256x128xbf16>, vector<128x128xf32> -> vector<128x128xf32>
      %c0_17 = arith.constant 0 : index
      %c0_18 = arith.constant 0 : index
      %21 = vector.load %arg7[%c0_17, %c0_18] : memref<1x128xf32, #tpu.memory_space<vmem>>, vector<1x128xf32>
      %22 = vector.broadcast %21 : vector<1x128xf32> to vector<128x128xf32>
      %23 = arith.addf %20, %22 : vector<128x128xf32>
      %cst_19 = arith.constant 0.000000e+00 : f32
      %24 = vector.broadcast %cst_19 : f32 to vector<128x128xf32>
      %25 = arith.maximumf %23, %24 : vector<128x128xf32>
      %c0_20 = arith.constant 0 : index
      %c0_21 = arith.constant 0 : index
      %26 = vector.load %arg8[%c0_20, %c0_21] : memref<8x128xbf16, #tpu.memory_space<vmem>>, vector<8x128xbf16>
      %27 = arith.truncf %25 : vector<128x128xf32> to vector<128x128xbf16>
      %cst_22 = arith.constant dense<0.000000e+00> : vector<8x128xf32>
      %28 = tpu.matmul %26, %27, %cst_22 {dimension_numbers = #tpu.dot_dimension_numbers<[1], [0], [0], [1], [0, 0, 1, 1], [], []>} : vector<8x128xbf16>, vector<128x128xbf16>, vector<8x128xf32> -> vector<8x128xf32>
      %c0_i32_23 = arith.constant 0 : i32
      %29 = arith.cmpi eq, %arg0, %c0_i32_23 : i32
      %30 = arith.extui %29 : i1 to i32
      %c0_i32_24 = arith.constant 0 : i32
      %31 = arith.cmpi ne, %30, %c0_i32_24 : i32
      scf.if %31 {
        %c0_29 = arith.constant 0 : index
        %c0_30 = arith.constant 0 : index
        %38 = vector.load %arg16[%c0_29, %c0_30] : memref<8x128xf32, #tpu.memory_space<vmem>>, vector<8x128xf32>
        tpu.vector_store %arg16[%c0_29, %c0_30], %28 {strides = array<i32>} : memref<8x128xf32, #tpu.memory_space<vmem>>, vector<8x128xf32>,
      } else {
      }
      %c0_i32_25 = arith.constant 0 : i32
      %32 = arith.cmpi ne, %arg0, %c0_i32_25 : i32
      %33 = arith.extui %32 : i1 to i32
      %c0_i32_26 = arith.constant 0 : i32
      %34 = arith.cmpi ne, %33, %c0_i32_26 : i32
      scf.if %34 {
        %c0_29 = arith.constant 0 : index
        %c0_30 = arith.constant 0 : index
        %38 = vector.load %arg16[%c0_29, %c0_30] : memref<8x128xf32, #tpu.memory_space<vmem>>, vector<8x128xf32>
        %39 = arith.addf %38, %28 : vector<8x128xf32>
        %c0_31 = arith.constant 0 : index
        %c0_32 = arith.constant 0 : index
        %40 = vector.load %arg16[%c0_31, %c0_32] : memref<8x128xf32, #tpu.memory_space<vmem>>, vector<8x128xf32>
        tpu.vector_store %arg16[%c0_31, %c0_32], %39 {strides = array<i32>} : memref<8x128xf32, #tpu.memory_space<vmem>>, vector<8x128xf32>,
      } else {
      }
      %c0_i32_27 = arith.constant 0 : i32
      %35 = arith.cmpi eq, %arg0, %c0_i32_27 : i32
      %36 = arith.extui %35 : i1 to i32
      %c0_i32_28 = arith.constant 0 : i32
      %37 = arith.cmpi ne, %36, %c0_i32_28 : i32
      scf.if %37 {
        %c0_29 = arith.constant 0 : index
        %c0_30 = arith.constant 0 : index
        %38 = vector.load %arg16[%c0_29, %c0_30] : memref<8x128xf32, #tpu.memory_space<vmem>>, vector<8x128xf32>
        %c0_31 = arith.constant 0 : index
        %c0_32 = arith.constant 0 : index
        %39 = vector.load %arg9[%c0_31, %c0_32] : memref<8x1xf32, #tpu.memory_space<vmem>>, vector<8x1xf32>
        %40 = vector.broadcast %39 : vector<8x1xf32> to vector<8x128xf32>
        %41 = arith.mulf %38, %40 : vector<8x128xf32>
        %42 = arith.truncf %41 : vector<8x128xf32> to vector<8x128xbf16>
        %c0_33 = arith.constant 0 : index
        %c0_34 = arith.constant 0 : index
        %43 = vector.load %arg10[%c0_33, %c0_34] : memref<128x128xbf16, #tpu.memory_space<vmem>>, vector<128x128xbf16>
        %cst_35 = arith.constant dense<0.000000e+00> : vector<8x128xf32>
        %44 = tpu.matmul %42, %43, %cst_35 {dimension_numbers = #tpu.dot_dimension_numbers<[1], [0], [0], [1], [0, 0, 1, 1], [], []>} : vector<8x128xbf16>, vector<128x128xbf16>, vector<8x128xf32> -> vector<8x128xf32>
        %c0_36 = arith.constant 0 : index
        %c0_37 = arith.constant 0 : index
        %45 = vector.load %arg11[%c0_36, %c0_37] : memref<1x128xf32, #tpu.memory_space<vmem>>, vector<1x128xf32>
        %46 = vector.broadcast %45 : vector<1x128xf32> to vector<8x128xf32>
        %47 = arith.addf %44, %46 : vector<8x128xf32>
        %cst_38 = arith.constant 0.000000e+00 : f32
        %48 = vector.broadcast %cst_38 : f32 to vector<8x128xf32>
        %49 = arith.maximumf %47, %48 : vector<8x128xf32>
        %50 = arith.truncf %49 : vector<8x128xf32> to vector<8x128xbf16>
        %c0_39 = arith.constant 0 : index
        %c0_40 = arith.constant 0 : index
        %51 = vector.load %arg12[%c0_39, %c0_40] : memref<128x128xbf16, #tpu.memory_space<vmem>>, vector<128x128xbf16>
        %cst_41 = arith.constant dense<0.000000e+00> : vector<8x128xf32>
        %52 = tpu.matmul %50, %51, %cst_41 {dimension_numbers = #tpu.dot_dimension_numbers<[1], [0], [0], [1], [0, 0, 1, 1], [], []>} : vector<8x128xbf16>, vector<128x128xbf16>, vector<8x128xf32> -> vector<8x128xf32>
        %c0_42 = arith.constant 0 : index
        %c0_43 = arith.constant 0 : index
        %53 = vector.load %arg13[%c0_42, %c0_43] : memref<1x128xf32, #tpu.memory_space<vmem>>, vector<1x128xf32>
        %54 = vector.broadcast %53 : vector<1x128xf32> to vector<8x128xf32>
        %55 = arith.addf %52, %54 : vector<8x128xf32>
        %c0_44 = arith.constant 0 : index
        %c0_45 = arith.constant 0 : index
        %56 = vector.load %arg14[%c0_44, %c0_45] : memref<8x128xf32, #tpu.memory_space<vmem>>, vector<8x128xf32>
        tpu.vector_store %arg14[%c0_44, %c0_45], %55 {strides = array<i32>} : memref<8x128xf32, #tpu.memory_space<vmem>>, vector<8x128xf32>,
      } else {
      }
    } else {
    }
    return
  }
  func.func @transform_0(%arg0: i32, %arg1: i32) -> (i32, i32) {
    %c0_i32 = arith.constant 0 : i32
    return %arg0, %arg1 : i32, i32
  }
  func.func @transform_1(%arg0: i32, %arg1: i32) -> (i32, i32) {
    %c0_i32 = arith.constant 0 : i32
    %c0_i32_0 = arith.constant 0 : i32
    return %arg1, %c0_i32 : i32, i32
  }
  func.func @transform_2(%arg0: i32, %arg1: i32) -> (i32, i32) {
    %c0_i32 = arith.constant 0 : i32
    %c0_i32_0 = arith.constant 0 : i32
    return %arg0, %c0_i32 : i32, i32
  }
  func.func @transform_3(%arg0: i32, %arg1: i32) -> (i32, i32) {
    %c0_i32 = arith.constant 0 : i32
    %c0_i32_0 = arith.constant 0 : i32
    return %arg0, %c0_i32 : i32, i32
  }
  func.func @transform_4(%arg0: i32, %arg1: i32) -> (i32, i32) {
    %c0_i32 = arith.constant 0 : i32
    %c0_i32_0 = arith.constant 0 : i32
    %c0_i32_1 = arith.constant 0 : i32
    return %c0_i32, %c0_i32_0 : i32, i32
  }
  func.func @transform_5(%arg0: i32, %arg1: i32) -> (i32, i32) {
    %c0_i32 = arith.constant 0 : i32
    %c0_i32_0 = arith.constant 0 : i32
    %c0_i32_1 = arith.constant 0 : i32
    return %c0_i32, %c0_i32_0 : i32, i32
  }
  func.func @transform_6(%arg0: i32, %arg1: i32) -> (i32, i32) {
    %c0_i32 = arith.constant 0 : i32
    %c0_i32_0 = arith.constant 0 : i32
    return %c0_i32, %arg0 : i32, i32
  }
  func.func @transform_7(%arg0: i32, %arg1: i32) -> (i32, i32) {
    %c0_i32 = arith.constant 0 : i32
    %c0_i32_0 = arith.constant 0 : i32
    %c0_i32_1 = arith.constant 0 : i32
    return %c0_i32, %c0_i32_0 : i32, i32
  }
  func.func @transform_8(%arg0: i32, %arg1: i32) -> (i32, i32) {
    %c0_i32 = arith.constant 0 : i32
    %c0_i32_0 = arith.constant 0 : i32
    %c0_i32_1 = arith.constant 0 : i32
    return %c0_i32, %c0_i32_0 : i32, i32
  }
  func.func @transform_9(%arg0: i32, %arg1: i32) -> (i32, i32) {
    %c0_i32 = arith.constant 0 : i32
    %c0_i32_0 = arith.constant 0 : i32
    %c0_i32_1 = arith.constant 0 : i32
    return %c0_i32, %c0_i32_0 : i32, i32
  }
  func.func @transform_10(%arg0: i32, %arg1: i32) -> (i32, i32) {
    %c0_i32 = arith.constant 0 : i32
    %c0_i32_0 = arith.constant 0 : i32
    %c0_i32_1 = arith.constant 0 : i32
    return %c0_i32, %c0_i32_0 : i32, i32
  }
  func.func @transform_11(%arg0: i32, %arg1: i32) -> (i32, i32) {
    %c0_i32 = arith.constant 0 : i32
    %c0_i32_0 = arith.constant 0 : i32
    %c0_i32_1 = arith.constant 0 : i32
    return %c0_i32, %c0_i32_0 : i32, i32
  }
  func.func @transform_12(%arg0: i32, %arg1: i32) -> (i32, i32) {
    %c0_i32 = arith.constant 0 : i32
    %c0_i32_0 = arith.constant 0 : i32
    %c0_i32_1 = arith.constant 0 : i32
    return %c0_i32, %c0_i32_0 : i32, i32
  }
}

</mosaic_0001>

<bundles_post_ra>
// kernel: graphsage_forward.3
= control target key start
LH: loop header
LB: loop body
LE: loop exit
PB: predicated region body
PF: predicated region fallthrough
CT: control target
= control target key end

     0   :  { %v1147_v1 = vmov 0   ;;  %s1396_s1 = inlined_call_operand.vmem [shape: bf16[128,128], index: 1, kind: input, shape index: {}, may-alias: {1,2}]   ;;  %s1397_s0 = inlined_call_operand.vmem [shape: bf16[128,128], index: 0, kind: input, shape index: {}]   ;;  %s1398_s3 = inlined_call_operand.vmem [shape: f32[128,1], index: 3, kind: input, shape index: {}]   ;;  %s1399_s4 = inlined_call_operand.vmem [shape: bf16[256,128], index: 4, kind: input, shape index: {}]   ;;  %s1400_s2 = inlined_call_operand.vmem [shape: bf16[128,128], index: 2, kind: input, shape index: {}, may-alias: {1,2}]   ;;  %s1401_s5 = inlined_call_operand.vmem [shape: f32[1,128], index: 5, kind: input, shape index: {}]   ;;  %s1402_s6 = inlined_call_operand.vmem [shape: bf16[128,128], index: 6, kind: output, shape index: {}]  }
   0x1   :  { %v1107_v0 = vld [vmem:[%s1396_s1] sm:$0xff]   ;;  %1105 = vset.pattern.permute.xlu0 %v1147_v1  ;;  %1106 = vset.pattern.permute.xlu1 %v1147_v1  ;;  %v1108_v2 = vld [vmem:[%s1396_s1 + $0x8] sm:$0xff]   ;;  %v1109_v3 = vld [vmem:[%s1396_s1 + $0x10] sm:$0xff]  }
   0x2   :  { %1056 = vmatprep.subr.bf16.mxu0 %v1107_v0  ;;  %v1110_v4 = vld [vmem:[%s1396_s1 + $0x18] sm:$0xff]   ;;  %v1115_v5 = vld [vmem:[%s1397_s0] sm:$0xff]   ;;  %v1112_v7 = vld [vmem:[%s1396_s1 + $0x28] sm:$0xff]  }
   0x3   :  { %1057 = vmatpush3.bf16.msra.mxu0 %v1107_v0  ;;  %1072 = vmatprep.mubr.bf16.mxu0 %v1115_v5  ;;  %v1111_v6 = vld [vmem:[%s1396_s1 + $0x20] sm:$0xff]   ;;  %v346_v9 = vld [vmem:[%s1398_s3 + $0x30] sm:$0xff]  ;;  %v345_v10 = vld [vmem:[%s1398_s3 + $0x28] sm:$0xff] }
   0x4   :  { %1058 = vmatprep.subr.bf16.mxu0 %v1108_v2  ;;  %v344_v8 = vld [vmem:[%s1398_s3 + $0x20] sm:$0xff]  ;;  %388 = vperm.xlu1 %1106, %v346_v9   ;;  %v347_v11 = vld [vmem:[%s1398_s3 + $0x38] sm:$0xff]  ;;  %v1113_v12 = vld [vmem:[%s1396_s1 + $0x30] sm:$0xff]  }
   0x5   :  { %378 = vperm.xlu0 %1105, %v344_v8   ;;  %v348_v13 = vld [vmem:[%s1398_s3 + $0x40] sm:$0xff]  ;;  %v349_v14 = vld [vmem:[%s1398_s3 + $0x48] sm:$0xff]  ;;  %v1114_v16 = vld [vmem:[%s1396_s1 + $0x38] sm:$0xff]  }
   0x6   :  { %v1123_v15 = vld [vmem:[%s1399_s4 + $0x40] sm:$0xff]   ;;  %v350_v17 = vld [vmem:[%s1398_s3 + $0x50] sm:$0xff]  ;;  %v1125_v19 = vld [vmem:[%s1399_s4 + $0x48] sm:$0xff]  }
   0x7   :  { %1059 = vmatpush3.bf16.msra.mxu0 %v1108_v2  ;;  %v1124_v18 = vld [vmem:[%s1399_s4] sm:$0xff]   ;;  %1088 = vmatprep.subr.bf16.mxu1 %v1123_v15  ;;  %v351_v20 = vld [vmem:[%s1398_s3 + $0x58] sm:$0xff]  ;;  %v1116_v21 = vld [vmem:[%s1397_s0 + $0x8] sm:$0xff]  }
   0x8   :  { %1060 = vmatprep.subr.bf16.mxu0 %v1109_v3  ;;  %393 = vperm.xlu1 %1106, %v347_v11   ;;  %v340_v22 = vld [vmem:[%s1398_s3] sm:$0xff]  ;;  %v341_v23 = vld [vmem:[%s1398_s3 + $0x8] sm:$0xff]  ;;  %v1117_v25 = vld [vmem:[%s1397_s0 + $0x10] sm:$0xff]  }
   0x9   :  { %383 = vperm.xlu0 %1105, %v345_v10   ;;  %1096 = vmatpush3.bf16.msra.mxu1 %v1124_v18  ;;  %v1126_v24 = vld [vmem:[%s1399_s4 + $0x8] sm:$0xff]   ;;  %v1127_v26 = vld [vmem:[%s1399_s4 + $0x50] sm:$0xff]   ;;  %v352_v27 = vld [vmem:[%s1398_s3 + $0x60] sm:$0xff] }
   0xa   :  { %1089 = vmatprep.subr.bf16.mxu1 %v1125_v19  ;;  %v353_v28 = vld [vmem:[%s1398_s3 + $0x68] sm:$0xff]  ;;  %v1128_v29 = vld [vmem:[%s1399_s4 + $0x10] sm:$0xff]   ;;  %v1129_v30 = vld [vmem:[%s1399_s4 + $0x58] sm:$0xff]  }
   0xb   :  { %1061 = vmatpush3.bf16.msra.mxu0 %v1109_v3  ;;  %v1130_v31 = vld [vmem:[%s1399_s4 + $0x18] sm:$0xff]   ;;  %v1131_v32 = vld [vmem:[%s1399_s4 + $0x60] sm:$0xff]   ;;  %v342_v34 = vld [vmem:[%s1398_s3 + $0x10] sm:$0xff] }
   0xc   :  { %1062 = vmatprep.subr.bf16.mxu0 %v1110_v4  ;;  %403 = vperm.xlu1 %1106, %v349_v14   ;;  %v1118_v33 = vld [vmem:[%s1397_s0 + $0x18] sm:$0xff]   ;;  %v1119_v36 = vld [vmem:[%s1397_s0 + $0x20] sm:$0xff]   ;;  %v354_v38 = vld [vmem:[%s1398_s3 + $0x70] sm:$0xff] }
   0xd   :  { %398 = vperm.xlu0 %1105, %v348_v13   ;;  %1097 = vmatpush3.bf16.msra.mxu1 %v1126_v24  ;;  %v343_v35 = vld [vmem:[%s1398_s3 + $0x18] sm:$0xff]  ;;  %v1132_v37 = vld [vmem:[%s1399_s4 + $0x20] sm:$0xff]   ;;  %v1133_v40 = vld [vmem:[%s1399_s4 + $0x68] sm:$0xff]  }
   0xe   :  { %1090 = vmatprep.subr.bf16.mxu1 %v1127_v26  ;;  %v355_v39 = vld [vmem:[%s1398_s3 + $0x78] sm:$0xff]  ;;  %v1134_v41 = vld [vmem:[%s1399_s4 + $0x28] sm:$0xff]   ;;  %v1121_v43 = vld [vmem:[%s1397_s0 + $0x30] sm:$0xff]  }
   0xf   :  { %1063 = vmatpush3.bf16.msra.mxu0 %v1110_v4  ;;  %v1120_v42 = vld [vmem:[%s1397_s0 + $0x28] sm:$0xff]   ;;  %v1122_v44 = vld [vmem:[%s1397_s0 + $0x38] sm:$0xff]   ;;  %v1135_v45 = vld [vmem:[%s1399_s4 + $0x70] sm:$0xff]  }
  0x10   :  { %1064 = vmatprep.subr.bf16.mxu0 %v1111_v6  ;;  %413 = vperm.xlu1 %1106, %v351_v20   ;;  %v1136_v46 = vld [vmem:[%s1399_s4 + $0x30] sm:$0xff]   ;;  %v1137_v47 = vld [vmem:[%s1399_s4 + $0x78] sm:$0xff]   ;;  %v1139_v49 = vld [vmem:[%s1400_s2] sm:$0xff]  }
  0x11   :  { %408 = vperm.xlu0 %1105, %v350_v17   ;;  %1098 = vmatpush3.bf16.msra.mxu1 %v1128_v29  ;;  %v1138_v48 = vld [vmem:[%s1399_s4 + $0x38] sm:$0xff]   ;;  %v1141_v50 = vld [vmem:[%s1400_s2 + $0x10] sm:$0xff]   ;;  %v1140_v10 = vld [vmem:[%s1400_s2 + $0x8] sm:$0xff]  }
  0x12   :  { %1091 = vmatprep.subr.bf16.mxu1 %v1129_v30  ;;  %707 = vmatprep.mubr.bf16.mxu1 %v1141_v50  ;;  %v1354_v50 = vld [vmem:[%s1401_s5] ss:$0 sm:$0xff] }
  0x13   :  { %1065 = vmatpush3.bf16.msra.mxu0 %v1111_v6 }
  0x14   :  { %1066 = vmatprep.subr.bf16.mxu0 %v1112_v7  ;;  %363 = vperm.xlu1 %1106, %v341_v23  }
  0x15   :  { %358 = vperm.xlu0 %1105, %v340_v22   ;;  %1099 = vmatpush3.bf16.msra.mxu1 %v1130_v31 }
  0x16   :  { %1092 = vmatprep.subr.bf16.mxu1 %v1131_v32 }
  0x17   :  { %1067 = vmatpush3.bf16.msra.mxu0 %v1112_v7 }
  0x18   :  { %1068 = vmatprep.subr.bf16.mxu0 %v1113_v12  ;;  %423 = vperm.xlu1 %1106, %v353_v28  }
  0x19   :  { %418 = vperm.xlu0 %1105, %v352_v27   ;;  %1100 = vmatpush3.bf16.msra.mxu1 %v1132_v37 }
  0x1a   :  { %1093 = vmatprep.subr.bf16.mxu1 %v1133_v40 }
  0x1b   :  { %1069 = vmatpush3.bf16.msra.mxu0 %v1113_v12 }
  0x1c   :  { %1070 = vmatprep.subr.bf16.mxu0 %v1114_v16  ;;  %373 = vperm.xlu1 %1106, %v343_v35  }
  0x1d   :  { %368 = vperm.xlu0 %1105, %v342_v34   ;;  %1101 = vmatpush3.bf16.msra.mxu1 %v1134_v41 }
  0x1e   :  { %1094 = vmatprep.subr.bf16.mxu1 %v1135_v45 }
  0x1f   :  { %1071 = vmatpush3.bf16.msra.mxu0 %v1114_v16 }
  0x20   :  { %992 = vmatprep.subr.bf16.mxu0 %v1123_v15  ;;  %433 = vperm.xlu1 %1106, %v355_v39  }
  0x21   :  { %428 = vperm.xlu0 %1105, %v354_v38   ;;  %1102 = vmatpush3.bf16.msra.mxu1 %v1136_v46 }
  0x22   :  { %1073 = vmatmul.mubr.bf16.vlgmr.msra.gmra.mrb[0].mxu0 %v1116_v21  ;;  %1095 = vmatprep.subr.bf16.mxu1 %v1137_v47  ;;  %v1142_v21 = vld [vmem:[%s1400_s2 + $0x18] sm:$0xff]  }
  0x23   :  { %1076 = vmatprep.mubr.bf16.mxu0 %v1117_v25  ;;  %993 = vmatpush3.bf16.msra.mxu0 %v1124_v18 }
  0x24   :  { %994 = vmatprep.subr.bf16.mxu0 %v1125_v19 }
  0x25   :  { %1103 = vmatpush3.bf16.msra.mxu1 %v1138_v48 }
  0x27   :  { %995 = vmatpush3.bf16.msra.mxu0 %v1126_v24 }
  0x28   :  { %996 = vmatprep.subr.bf16.mxu0 %v1127_v26 }
  0x2a   :  { %1077 = vmatmul.mubr.bf16.gmra.mrb[4].mxu0 %v1118_v33 }
  0x2b   :  { %1080 = vmatprep.mubr.bf16.mxu0 %v1119_v36  ;;  %997 = vmatpush3.bf16.msra.mxu0 %v1128_v29 }
  0x2c   :  { %998 = vmatprep.subr.bf16.mxu0 %v1129_v30 }
  0x2f   :  { %999 = vmatpush3.bf16.msra.mxu0 %v1130_v31 }
  0x30   :  { %1000 = vmatprep.subr.bf16.mxu0 %v1131_v32  ;;  %v1143_v32 = vld [vmem:[%s1400_s2 + $0x20] sm:$0xff]  }
  0x32   :  { %1081 = vmatmul.mubr.bf16.gmra.mrb[8].mxu0 %v1120_v42 }
  0x33   :  { %1084 = vmatprep.mubr.bf16.mxu0 %v1121_v43  ;;  %1001 = vmatpush3.bf16.msra.mxu0 %v1132_v37 }
  0x34   :  { %1002 = vmatprep.subr.bf16.mxu0 %v1133_v40 }
  0x37   :  { %1003 = vmatpush3.bf16.msra.mxu0 %v1134_v41 }
  0x38   :  { %1004 = vmatprep.subr.bf16.mxu0 %v1135_v45  ;;  %v1144_v45 = vld [vmem:[%s1400_s2 + $0x28] sm:$0xff]  }
  0x3a   :  { %1085 = vmatmul.mubr.bf16.gmra.mrb[12].mxu0 %v1122_v44 }
  0x3b   :  { %1005 = vmatpush3.bf16.msra.mxu0 %v1136_v46  ;;  %691 = vmatprep.mubr.bf16.mxu0 %v1139_v49 }
  0x3c   :  { %1006 = vmatprep.subr.bf16.mxu0 %v1137_v47  ;;  %v1145_v47 = vld [vmem:[%s1400_s2 + $0x30] sm:$0xff]  }
  0x3f   :  { %1007 = vmatpush3.bf16.msra.mxu0 %v1138_v48  ;;  %v1146_v48 = vld [vmem:[%s1400_s2 + $0x38] sm:$0xff]  }
  0x83   :  { %v389_v52 = vpop.permute.xlu1 %388 }
  0x84   :  { %v379_v51 = vpop.permute.xlu0 %378 }
  0x87   :  { %v394_v54 = vpop.permute.xlu1 %393 }
  0x88   :  { %v384_v53 = vpop.permute.xlu0 %383 }
  0x8b   :  { %v404_v56 = vpop.permute.xlu1 %403 }
  0x8c   :  { %v399_v55 = vpop.permute.xlu0 %398 }
  0x8f   :  { %v414_v58 = vpop.permute.xlu1 %413 }
  0x90   :  { %v409_v57 = vpop.permute.xlu0 %408 }
  0x93   :  { %v364_v60 = vpop.permute.xlu1 %363 }
  0x94   :  { %v359_v59 = vpop.permute.xlu0 %358 }
  0x97   :  { %v424_v62 = vpop.permute.xlu1 %423 }
  0x98   :  { %v419_v61 = vpop.permute.xlu0 %418 }
  0x9b   :  { %v374_v1 = vpop.permute.xlu1 %373 }
  0x9c   :  { %v369_v63 = vpop.permute.xlu0 %368 }
  0x9f   :  { %v434_v37 = vpop.permute.xlu1 %433 }
  0xa0   :  { %v429_v35 = vpop.permute.xlu0 %428 }
  0xf5   :  { %v1074_v0 = vpop.f32.mrb[0].mxu0 }
  0xf6   :  { %v186_v2 = vpop.f32.mrb[1].mxu0  ;;  %v438_v4 = vmul.f32 %v1074_v0, %v369_v63 }
  0xf7   :  { %v1075_v3 = vpop.f32.mrb[2].mxu0  ;;  %v436_v7 = vmul.f32 %v359_v59, %v186_v2 }
  0xf8   :  { %v439_v5 = vmul.f32 %v1075_v3, %v374_v1  ;;  %v189_v6 = vpop.f32.mrb[3].mxu0 }
  0xf9   :  { %v437_v8 = vmul.f32 %v364_v60, %v189_v6 }
  0xfa   :  { %v453_v9 = vpack.c.bf16 %v439_v5, %v438_v4 }
  0xfb   :  { %v452_v11 = vpack.c.bf16 %v437_v8, %v436_v7 }
  0xfd   :  { %v1078_v12 = vpop.f32.mrb[4].mxu0  ;;  %692 = vmatmul.mubr.bf16.vlgmr.msra.gmra.mrb[16].mxu0 %v452_v11 }
  0xfe   :  { %v202_v13 = vpop.f32.mrb[5].mxu0  ;;  %699 = vmatprep.mubr.bf16.mxu0 %v1140_v10  ;;  %v442_v15 = vmul.f32 %v1078_v12, %v389_v52 }
  0xff   :  { %v1079_v14 = vpop.f32.mrb[6].mxu0  ;;  %v440_v18 = vmul.f32 %v379_v51, %v202_v13 }
 0x100   :  { %v443_v16 = vmul.f32 %v1079_v14, %v394_v54  ;;  %v205_v17 = vpop.f32.mrb[7].mxu0 }
 0x101   :  { %v441_v19 = vmul.f32 %v384_v53, %v205_v17 }
 0x102   :  { %v455_v20 = vpack.c.bf16 %v443_v16, %v442_v15 }
 0x103   :  { %v454_v22 = vpack.c.bf16 %v441_v19, %v440_v18 }
 0x105   :  { %v1082_v23 = vpop.f32.mrb[8].mxu0  ;;  %700 = vmatmul.mubr.bf16.gmra.mrb[20].mxu0 %v453_v9  ;;  %708 = vmatmul.mubr.bf16.vlgmr.msra.gmra.mrb[0].mxu1 %v454_v22 }
 0x106   :  { %v218_v24 = vpop.f32.mrb[9].mxu0  ;;  %715 = vmatprep.mubr.bf16.mxu1 %v1142_v21  ;;  %v446_v26 = vmul.f32 %v1082_v23, %v409_v57 }
 0x107   :  { %v1083_v25 = vpop.f32.mrb[10].mxu0  ;;  %v444_v29 = vmul.f32 %v399_v55, %v218_v24 }
 0x108   :  { %v447_v27 = vmul.f32 %v1083_v25, %v414_v58  ;;  %v221_v28 = vpop.f32.mrb[11].mxu0 }
 0x109   :  { %v445_v30 = vmul.f32 %v404_v56, %v221_v28 }
 0x10a   :  { %v457_v31 = vpack.c.bf16 %v447_v27, %v446_v26 }
 0x10b   :  { %v456_v33 = vpack.c.bf16 %v445_v30, %v444_v29 }
 0x10d   :  { %v1086_v34 = vpop.f32.mrb[12].mxu0  ;;  %716 = vmatmul.mubr.bf16.gmra.mrb[4].mxu1 %v455_v20 }
 0x10e   :  { %v234_v36 = vpop.f32.mrb[13].mxu0  ;;  %723 = vmatprep.mubr.bf16.mxu1 %v1143_v32  ;;  %v450_v39 = vmul.f32 %v1086_v34, %v429_v35 }
 0x10f   :  { %v1087_v38 = vpop.f32.mrb[14].mxu0  ;;  %v448_v42 = vmul.f32 %v419_v61, %v234_v36 }
 0x110   :  { %v451_v40 = vmul.f32 %v1087_v38, %v434_v37  ;;  %v237_v41 = vpop.f32.mrb[15].mxu0 }
 0x111   :  { %v449_v43 = vmul.f32 %v424_v62, %v237_v41 }
 0x112   :  { %v459_v44 = vpack.c.bf16 %v451_v40, %v450_v39 }
 0x113   :  { %v458_v46 = vpack.c.bf16 %v449_v43, %v448_v42 }
 0x115   :  { %724 = vmatmul.mubr.bf16.gmra.mrb[8].mxu1 %v456_v33 }
 0x116   :  { %731 = vmatprep.mubr.bf16.mxu1 %v1144_v45 }
 0x11d   :  { %732 = vmatmul.mubr.bf16.gmra.mrb[12].mxu1 %v457_v31 }
 0x11e   :  { %739 = vmatprep.mubr.bf16.mxu1 %v1145_v47 }
 0x125   :  { %740 = vmatmul.mubr.bf16.gmra.mrb[16].mxu1 %v458_v46 }
 0x126   :  { %747 = vmatprep.mubr.bf16.mxu1 %v1146_v48 }
 0x12d   :  { %748 = vmatmul.mubr.bf16.gmra.mrb[20].mxu1 %v459_v44 }
 0x1d0   :  { %v1008_v49 = vpop.f32.mrb[16].mxu0 }
 0x1d1   :  { %v1009_v51 = vpop.f32.mrb[17].mxu0 }
 0x1d2   :  { %v1010_v52 = vadd.f32 %v1009_v51, %v1008_v49  ;;  %v1011_v53 = vpop.f32.mrb[18].mxu0 }
 0x1d3   :  { %v1012_v54 = vpop.f32.mrb[19].mxu0 }
 0x1d4   :  { %v694_v55 = vadd.f32 %v1010_v52, %v1354_v50  ;;  %v1013_v56 = vadd.f32 %v1012_v54, %v1011_v53 }
 0x1d6   :  { %v697_v57 = vadd.f32 %v1013_v56, %v1354_v50  ;;  %v756_v58 = vmax.f32 %v694_v55, 0.0 }
 0x1d8   :  { %v757_v59 = vmax.f32 %v697_v57, 0.0  ;;  %v1014_v60 = vpop.f32.mrb[20].mxu0  ;;  %v1020_v61 = vpop.f32.mrb[0].mxu1 }
 0x1d9   :  { %v1015_v62 = vpop.f32.mrb[21].mxu0  ;;  %v1021_v63 = vpop.f32.mrb[1].mxu1 }
 0x1da   :  { %v932_v0 = vpack.c.bf16 %v757_v59, %v756_v58  ;;  %v1016_v1 = vadd.f32 %v1015_v62, %v1014_v60  ;;  %v1022_v2 = vadd.f32 %v1021_v63, %v1020_v61  ;;  %v1017_v3 = vpop.f32.mrb[22].mxu0  ;;  %v1023_v4 = vpop.f32.mrb[2].mxu1 }
 0x1db   :  { %v1018_v5 = vpop.f32.mrb[23].mxu0  ;;  %v1024_v6 = vpop.f32.mrb[3].mxu1 }
 0x1dc   :  { %933 = vst [vmem:[%s1402_s6] sm:$0xff] %v932_v0   ;;  %v702_v7 = vadd.f32 %v1016_v1, %v1354_v50  ;;  %v710_v8 = vadd.f32 %v1022_v2, %v1354_v50  ;;  %v1019_v9 = vadd.f32 %v1018_v5, %v1017_v3  ;;  %v1025_v10 = vadd.f32 %v1024_v6, %v1023_v4 }
 0x1de   :  { %v705_v11 = vadd.f32 %v1019_v9, %v1354_v50  ;;  %v713_v12 = vadd.f32 %v1025_v10, %v1354_v50  ;;  %v758_v13 = vmax.f32 %v702_v7, 0.0  ;;  %v760_v14 = vmax.f32 %v710_v8, 0.0 }
 0x1e0   :  { %v759_v15 = vmax.f32 %v705_v11, 0.0  ;;  %v761_v16 = vmax.f32 %v713_v12, 0.0  ;;  %v1026_v17 = vpop.f32.mrb[4].mxu1 }
 0x1e1   :  { %v1027_v18 = vpop.f32.mrb[5].mxu1 }
 0x1e2   :  { %v937_v19 = vpack.c.bf16 %v759_v15, %v758_v13  ;;  %v942_v20 = vpack.c.bf16 %v761_v16, %v760_v14  ;;  %v1028_v21 = vadd.f32 %v1027_v18, %v1026_v17  ;;  %v1029_v22 = vpop.f32.mrb[6].mxu1 }
 0x1e3   :  { %v1030_v23 = vpop.f32.mrb[7].mxu1 }
 0x1e4   :  { %969 = vst [vmem:[%s1402_s6 + $0x8] sm:$0xff] %v937_v19   ;;  %970 = vst [vmem:[%s1402_s6 + $0x10] sm:$0xff] %v942_v20   ;;  %v718_v24 = vadd.f32 %v1028_v21, %v1354_v50  ;;  %v1031_v25 = vadd.f32 %v1030_v23, %v1029_v22 }
 0x1e6   :  { %v721_v26 = vadd.f32 %v1031_v25, %v1354_v50  ;;  %v762_v27 = vmax.f32 %v718_v24, 0.0 }
 0x1e8   :  { %v763_v28 = vmax.f32 %v721_v26, 0.0  ;;  %v1032_v29 = vpop.f32.mrb[8].mxu1 }
 0x1e9   :  { %v1033_v30 = vpop.f32.mrb[9].mxu1 }
 0x1ea   :  { %v947_v31 = vpack.c.bf16 %v763_v28, %v762_v27  ;;  %v1034_v32 = vadd.f32 %v1033_v30, %v1032_v29  ;;  %v1035_v33 = vpop.f32.mrb[10].mxu1 }
 0x1eb   :  { %v1036_v34 = vpop.f32.mrb[11].mxu1 }
 0x1ec   :  { %971 = vst [vmem:[%s1402_s6 + $0x18] sm:$0xff] %v947_v31   ;;  %v726_v35 = vadd.f32 %v1034_v32, %v1354_v50  ;;  %v1037_v36 = vadd.f32 %v1036_v34, %v1035_v33 }
 0x1ee   :  { %v729_v37 = vadd.f32 %v1037_v36, %v1354_v50  ;;  %v764_v38 = vmax.f32 %v726_v35, 0.0 }
 0x1f0   :  { %v765_v39 = vmax.f32 %v729_v37, 0.0  ;;  %v1038_v40 = vpop.f32.mrb[12].mxu1 }
 0x1f1   :  { %v1039_v41 = vpop.f32.mrb[13].mxu1 }
 0x1f2   :  { %v952_v42 = vpack.c.bf16 %v765_v39, %v764_v38  ;;  %v1040_v43 = vadd.f32 %v1039_v41, %v1038_v40  ;;  %v1041_v44 = vpop.f32.mrb[14].mxu1 }
 0x1f3   :  { %v1042_v45 = vpop.f32.mrb[15].mxu1 }
 0x1f4   :  { %972 = vst [vmem:[%s1402_s6 + $0x20] sm:$0xff] %v952_v42   ;;  %v734_v46 = vadd.f32 %v1040_v43, %v1354_v50  ;;  %v1043_v47 = vadd.f32 %v1042_v45, %v1041_v44 }
 0x1f6   :  { %v737_v48 = vadd.f32 %v1043_v47, %v1354_v50  ;;  %v766_v49 = vmax.f32 %v734_v46, 0.0 }
 0x1f8   :  { %v767_v51 = vmax.f32 %v737_v48, 0.0  ;;  %v1044_v52 = vpop.f32.mrb[16].mxu1 }
 0x1f9   :  { %v1045_v53 = vpop.f32.mrb[17].mxu1 }
 0x1fa   :  { %v957_v54 = vpack.c.bf16 %v767_v51, %v766_v49  ;;  %v1046_v55 = vadd.f32 %v1045_v53, %v1044_v52  ;;  %v1047_v56 = vpop.f32.mrb[18].mxu1 }
 0x1fb   :  { %v1048_v57 = vpop.f32.mrb[19].mxu1 }
 0x1fc   :  { %973 = vst [vmem:[%s1402_s6 + $0x28] sm:$0xff] %v957_v54   ;;  %v742_v58 = vadd.f32 %v1046_v55, %v1354_v50  ;;  %v1049_v59 = vadd.f32 %v1048_v57, %v1047_v56 }
 0x1fe   :  { %v745_v60 = vadd.f32 %v1049_v59, %v1354_v50  ;;  %v768_v61 = vmax.f32 %v742_v58, 0.0 }
 0x200   :  { %v769_v62 = vmax.f32 %v745_v60, 0.0  ;;  %v1050_v63 = vpop.f32.mrb[20].mxu1 }
 0x201   :  { %v1051_v0 = vpop.f32.mrb[21].mxu1 }
 0x202   :  { %v962_v1 = vpack.c.bf16 %v769_v62, %v768_v61  ;;  %v1052_v2 = vadd.f32 %v1051_v0, %v1050_v63  ;;  %v1053_v3 = vpop.f32.mrb[22].mxu1 }
 0x203   :  { %v1054_v4 = vpop.f32.mrb[23].mxu1 }
 0x204   :  { %974 = vst [vmem:[%s1402_s6 + $0x30] sm:$0xff] %v962_v1   ;;  %v750_v5 = vadd.f32 %v1052_v2, %v1354_v50  ;;  %v1055_v6 = vadd.f32 %v1054_v4, %v1053_v3 }
 0x206   :  { %v753_v7 = vadd.f32 %v1055_v6, %v1354_v50  ;;  %v770_v8 = vmax.f32 %v750_v5, 0.0 }
 0x208   :  { %v771_v9 = vmax.f32 %v753_v7, 0.0 }
 0x20a   :  { %v967_v10 = vpack.c.bf16 %v771_v9, %v770_v8 }
 0x20c   :  { %975 = vst [vmem:[%s1402_s6 + $0x38] sm:$0xff] %v967_v10  }

// kernel: graphsage_forward.5
= control target key start
LH: loop header
LB: loop body
LE: loop exit
PB: predicated region body
PF: predicated region fallthrough
CT: control target
= control target key end

     0   :  { %v1411_v1 = vmov 0   ;;  %vm1413_vm0 = vmmov 0   ;;  %s1761_s1 = inlined_call_operand.vmem [shape: bf16[128,128], index: 1, kind: input, shape index: {}, may-alias: {1,2}]   ;;  %s1762_s0 = inlined_call_operand.vmem [shape: bf16[128,128], index: 0, kind: input, shape index: {}]   ;;  %s1763_s3 = inlined_call_operand.vmem [shape: f32[128,1], index: 3, kind: input, shape index: {}]   ;;  %s1764_s4 = inlined_call_operand.vmem [shape: bf16[256,128], index: 4, kind: input, shape index: {}]   ;;  %s1765_s7 = inlined_call_operand.vmem [shape: f32[8,1], index: 7, kind: input, shape index: {}]   ;;  %s1766_s2 = inlined_call_operand.vmem [shape: bf16[128,128], index: 2, kind: input, shape index: {}, may-alias: {1,2}]   ;;  %s1767_s8 = inlined_call_operand.vmem [shape: bf16[128,128], index: 8, kind: input, shape index: {}]   ;;  %s1768_s5 = inlined_call_operand.vmem [shape: f32[1,128], index: 5, kind: input, shape index: {}]   ;;  %s1769_s6 = inlined_call_operand.vmem [shape: bf16[8,128], index: 6, kind: input, shape index: {}]   ;;  %s1770_s10 = inlined_call_operand.vmem [shape: bf16[128,128], index: 10, kind: input, shape index: {}]   ;;  %s1771_s9 = inlined_call_operand.vmem [shape: f32[1,128], index: 9, kind: input, shape index: {}]   ;;  %s1772_s11 = inlined_call_operand.vmem [shape: f32[1,128], index: 11, kind: input, shape index: {}]   ;;  %s1773_s12 = inlined_call_operand.vmem [shape: f32[8,128], index: 12, kind: output, shape index: {}]  }
   0x1   :  { %v1355_v0 = vld [vmem:[%s1761_s1] sm:$0xff]   ;;  %1353 = vset.pattern.permute.xlu0 %v1411_v1  ;;  %1354 = vset.pattern.permute.xlu1 %v1411_v1  ;;  %v1356_v2 = vld [vmem:[%s1761_s1 + $0x8] sm:$0xff]   ;;  %v1357_v3 = vld [vmem:[%s1761_s1 + $0x10] sm:$0xff]  }
   0x2   :  { %1258 = vmatprep.subr.bf16.mxu0 %v1355_v0  ;;  %v1358_v4 = vld [vmem:[%s1761_s1 + $0x18] sm:$0xff]   ;;  %v1363_v5 = vld [vmem:[%s1762_s0] sm:$0xff]   ;;  %v1360_v7 = vld [vmem:[%s1761_s1 + $0x28] sm:$0xff]  }
   0x3   :  { %1259 = vmatpush3.bf16.msra.mxu0 %v1355_v0  ;;  %1274 = vmatprep.mubr.bf16.mxu0 %v1363_v5  ;;  %v1359_v6 = vld [vmem:[%s1761_s1 + $0x20] sm:$0xff]   ;;  %v360_v9 = vld [vmem:[%s1763_s3 + $0x10] sm:$0xff]  ;;  %v359_v10 = vld [vmem:[%s1763_s3 + $0x8] sm:$0xff] }
   0x4   :  { %1260 = vmatprep.subr.bf16.mxu0 %v1356_v2  ;;  %v358_v8 = vld [vmem:[%s1763_s3] sm:$0xff]  ;;  %386 = vperm.xlu1 %1354, %v360_v9   ;;  %v361_v11 = vld [vmem:[%s1763_s3 + $0x18] sm:$0xff]  ;;  %v1361_v12 = vld [vmem:[%s1761_s1 + $0x30] sm:$0xff]  }
   0x5   :  { %376 = vperm.xlu0 %1353, %v358_v8   ;;  %v362_v13 = vld [vmem:[%s1763_s3 + $0x20] sm:$0xff]  ;;  %v363_v14 = vld [vmem:[%s1763_s3 + $0x28] sm:$0xff]  ;;  %v1362_v15 = vld [vmem:[%s1761_s1 + $0x38] sm:$0xff]  }
   0x6   :  { %v364_v16 = vld [vmem:[%s1763_s3 + $0x30] sm:$0xff]  ;;  %v365_v17 = vld [vmem:[%s1763_s3 + $0x38] sm:$0xff]  ;;  %v1371_v18 = vld [vmem:[%s1764_s4 + $0x40] sm:$0xff]  }
   0x7   :  { %1261 = vmatpush3.bf16.msra.mxu0 %v1356_v2  ;;  %v1372_v19 = vld [vmem:[%s1764_s4] sm:$0xff]   ;;  %1167 = vmatprep.subr.bf16.mxu1 %v1371_v18  ;;  %v1364_v20 = vld [vmem:[%s1762_s0 + $0x8] sm:$0xff]   ;;  %v1365_v24 = vld [vmem:[%s1762_s0 + $0x10] sm:$0xff]  }
   0x8   :  { %1262 = vmatprep.subr.bf16.mxu0 %v1357_v3  ;;  %391 = vperm.xlu1 %1354, %v361_v11   ;;  %v366_v21 = vld [vmem:[%s1763_s3 + $0x40] sm:$0xff]  ;;  %v1373_v22 = vld [vmem:[%s1764_s4 + $0x48] sm:$0xff]   ;;  %v368_v26 = vld [vmem:[%s1763_s3 + $0x50] sm:$0xff] }
   0x9   :  { %381 = vperm.xlu0 %1353, %v359_v10   ;;  %1168 = vmatpush3.bf16.msra.mxu1 %v1372_v19  ;;  %v1374_v23 = vld [vmem:[%s1764_s4 + $0x8] sm:$0xff]   ;;  %v1375_v27 = vld [vmem:[%s1764_s4 + $0x50] sm:$0xff]   ;;  %v369_v29 = vld [vmem:[%s1763_s3 + $0x58] sm:$0xff] }
   0xa   :  { %v367_v25 = vld [vmem:[%s1763_s3 + $0x48] sm:$0xff]  ;;  %1169 = vmatprep.subr.bf16.mxu1 %v1373_v22  ;;  %v1376_v28 = vld [vmem:[%s1764_s4 + $0x10] sm:$0xff]   ;;  %v1377_v30 = vld [vmem:[%s1764_s4 + $0x58] sm:$0xff]  }
   0xb   :  { %1263 = vmatpush3.bf16.msra.mxu0 %v1357_v3  ;;  %v1378_v31 = vld [vmem:[%s1764_s4 + $0x18] sm:$0xff]   ;;  %v370_v33 = vld [vmem:[%s1763_s3 + $0x60] sm:$0xff]  ;;  %v371_v35 = vld [vmem:[%s1763_s3 + $0x68] sm:$0xff] }
   0xc   :  { %1264 = vmatprep.subr.bf16.mxu0 %v1358_v4  ;;  %401 = vperm.xlu1 %1354, %v363_v14   ;;  %v1366_v32 = vld [vmem:[%s1762_s0 + $0x18] sm:$0xff]   ;;  %v1367_v34 = vld [vmem:[%s1762_s0 + $0x20] sm:$0xff]   ;;  %v372_v38 = vld [vmem:[%s1763_s3 + $0x70] sm:$0xff] }
   0xd   :  { %396 = vperm.xlu0 %1353, %v362_v13   ;;  %1170 = vmatpush3.bf16.msra.mxu1 %v1374_v23  ;;  %v1379_v36 = vld [vmem:[%s1764_s4 + $0x60] sm:$0xff]   ;;  %v373_v39 = vld [vmem:[%s1763_s3 + $0x78] sm:$0xff]  ;;  %v1381_v40 = vld [vmem:[%s1764_s4 + $0x68] sm:$0xff]  }
   0xe   :  { %1171 = vmatprep.subr.bf16.mxu1 %v1375_v27  ;;  %v1380_v37 = vld [vmem:[%s1764_s4 + $0x20] sm:$0xff]   ;;  %v1382_v41 = vld [vmem:[%s1764_s4 + $0x28] sm:$0xff]   ;;  %v1369_v44 = vld [vmem:[%s1762_s0 + $0x30] sm:$0xff]  }
   0xf   :  { %1265 = vmatpush3.bf16.msra.mxu0 %v1358_v4  ;;  %v1368_v42 = vld [vmem:[%s1762_s0 + $0x28] sm:$0xff]   ;;  %v855_v43 = vld [vmem:[%s1765_s7] sm:$0xff]  ;;  %v1370_v45 = vld [vmem:[%s1762_s0 + $0x38] sm:$0xff]  }
  0x10   :  { %1266 = vmatprep.subr.bf16.mxu0 %v1359_v6  ;;  %411 = vperm.xlu1 %1354, %v365_v17   ;;  %v1383_v46 = vld [vmem:[%s1764_s4 + $0x70] sm:$0xff]   ;;  %v1385_v48 = vld [vmem:[%s1764_s4 + $0x78] sm:$0xff]   ;;  %v1387_v50 = vld [vmem:[%s1766_s2] sm:$0xff]  }
  0x11   :  { %406 = vperm.xlu0 %1353, %v364_v16   ;;  %1172 = vmatpush3.bf16.msra.mxu1 %v1376_v28  ;;  %v1384_v47 = vld [vmem:[%s1764_s4 + $0x30] sm:$0xff]   ;;  %v1386_v49 = vld [vmem:[%s1764_s4 + $0x38] sm:$0xff]   ;;  %v1388_v4 = vld [vmem:[%s1766_s2 + $0x8] sm:$0xff]  }
  0x12   :  { %1173 = vmatprep.subr.bf16.mxu1 %v1377_v30  ;;  %709 = vmatprep.mubr.bf16.mxu1 %v1387_v50  ;;  %v1389_v18 = vld [vmem:[%s1766_s2 + $0x10] sm:$0xff]   ;;  %v1412_v50 = vmov 0.0  }
  0x13   :  { %1267 = vmatpush3.bf16.msra.mxu0 %v1359_v6 }
  0x14   :  { %1268 = vmatprep.subr.bf16.mxu0 %v1360_v7  ;;  %421 = vperm.xlu1 %1354, %v367_v25  }
  0x15   :  { %416 = vperm.xlu0 %1353, %v366_v21   ;;  %1174 = vmatpush3.bf16.msra.mxu1 %v1378_v31 }
  0x16   :  { %1175 = vmatprep.subr.bf16.mxu1 %v1379_v36 }
  0x17   :  { %1269 = vmatpush3.bf16.msra.mxu0 %v1360_v7 }
  0x18   :  { %1270 = vmatprep.subr.bf16.mxu0 %v1361_v12  ;;  %431 = vperm.xlu1 %1354, %v369_v29  }
  0x19   :  { %426 = vperm.xlu0 %1353, %v368_v26   ;;  %1176 = vmatpush3.bf16.msra.mxu1 %v1380_v37 }
  0x1a   :  { %1177 = vmatprep.subr.bf16.mxu1 %v1381_v40 }
  0x1b   :  { %1271 = vmatpush3.bf16.msra.mxu0 %v1361_v12 }
  0x1c   :  { %1272 = vmatprep.subr.bf16.mxu0 %v1362_v15  ;;  %441 = vperm.xlu1 %1354, %v371_v35  }
  0x1d   :  { %436 = vperm.xlu0 %1353, %v370_v33   ;;  %1178 = vmatpush3.bf16.msra.mxu1 %v1382_v41 }
  0x1e   :  { %1179 = vmatprep.subr.bf16.mxu1 %v1383_v46 }
  0x1f   :  { %1273 = vmatpush3.bf16.msra.mxu0 %v1362_v15 }
  0x20   :  { %451 = vperm.xlu1 %1354, %v373_v39   ;;  %1290 = vmatprep.subr.bf16.mxu0 %v1412_v50 }
  0x21   :  { %446 = vperm.xlu0 %1353, %v372_v38   ;;  %1180 = vmatpush3.bf16.msra.mxu1 %v1384_v47  ;;  %v1392_v47 = vld [vmem:[%s1766_s2 + $0x28] sm:$0xff]  }
  0x22   :  { %1275 = vmatmul.mubr.bf16.vlgmr.msra.gmra.mrb[0].mxu0 %v1364_v20  ;;  %1181 = vmatprep.subr.bf16.mxu1 %v1385_v48  ;;  %v1393_v48 = vld [vmem:[%s1766_s2 + $0x30] sm:$0xff]  }
  0x23   :  { %1278 = vmatprep.mubr.bf16.mxu0 %v1365_v24 }
  0x25   :  { %858 = vperm.xlu0 %1353, %v855_v43   ;;  %1182 = vmatpush3.bf16.msra.mxu1 %v1386_v49  ;;  %v1394_v49 = vld [vmem:[%s1766_s2 + $0x38] sm:$0xff]  }
  0x26   :  { %1330 = vmatprep.subr.bf16.mxu1 %v1412_v50 }
  0x2a   :  { %1279 = vmatmul.mubr.bf16.gmra.mrb[4].mxu0 %v1366_v32  ;;  %v1390_v32 = vld [vmem:[%s1766_s2 + $0x18] sm:$0xff]  }
  0x2b   :  { %1282 = vmatprep.mubr.bf16.mxu0 %v1367_v34 }
  0x32   :  { %1283 = vmatmul.mubr.bf16.gmra.mrb[8].mxu0 %v1368_v42 }
  0x33   :  { %1286 = vmatprep.mubr.bf16.mxu0 %v1369_v44 }
  0x3a   :  { %1287 = vmatmul.mubr.bf16.gmra.mrb[12].mxu0 %v1370_v45  ;;  %v1391_v45 = vld [vmem:[%s1766_s2 + $0x20] sm:$0xff]  }
  0x3b   :  { %1306 = vmatprep.mubr.msk.bf16.mxu0 %vm1413_vm0, %v1412_v50 }
  0x83   :  { %v387_v52 = vpop.permute.xlu1 %386 }
  0x84   :  { %v377_v51 = vpop.permute.xlu0 %376 }
  0x87   :  { %v392_v54 = vpop.permute.xlu1 %391 }
  0x88   :  { %v382_v53 = vpop.permute.xlu0 %381 }
  0x8b   :  { %v402_v56 = vpop.permute.xlu1 %401 }
  0x8c   :  { %v397_v55 = vpop.permute.xlu0 %396 }
  0x8f   :  { %v412_v60 = vpop.permute.xlu1 %411 }
  0x90   :  { %v407_v58 = vpop.permute.xlu0 %406 }
  0x93   :  { %v422_v7 = vpop.permute.xlu1 %421 }
  0x94   :  { %v417_v6 = vpop.permute.xlu0 %416 }
  0x97   :  { %v432_v19 = vpop.permute.xlu1 %431 }
  0x98   :  { %v427_v16 = vpop.permute.xlu0 %426 }
  0x9b   :  { %v442_v28 = vpop.permute.xlu1 %441 }
  0x9c   :  { %v437_v24 = vpop.permute.xlu0 %436 }
  0x9f   :  { %v452_v37 = vpop.permute.xlu1 %451 }
  0xa0   :  { %v447_v35 = vpop.permute.xlu0 %446 }
  0xf5   :  { %v1276_v57 = vpop.f32.mrb[0].mxu0 }
  0xf6   :  { %v204_v59 = vpop.f32.mrb[1].mxu0  ;;  %v456_v62 = vmul.f32 %v1276_v57, %v387_v52  ;;  %v1659_v52 = vld [vmem:[%s1768_s5] ss:$0 sm:$0xff] }
  0xf7   :  { %v1277_v61 = vpop.f32.mrb[2].mxu0  ;;  %v454_v1 = vmul.f32 %v377_v51, %v204_v59 }
  0xf8   :  { %v457_v63 = vmul.f32 %v1277_v61, %v392_v54  ;;  %v207_v0 = vpop.f32.mrb[3].mxu0 }
  0xf9   :  { %v455_v2 = vmul.f32 %v382_v53, %v207_v0 }
  0xfa   :  { %v471_v3 = vpack.c.bf16 %v457_v63, %v456_v62 }
  0xfb   :  { %v470_v5 = vpack.c.bf16 %v455_v2, %v454_v1 }
  0xfd   :  { %v1280_v8 = vpop.f32.mrb[4].mxu0  ;;  %710 = vmatmul.mubr.bf16.vlgmr.msra.gmra.mrb[0].mxu1 %v470_v5 }
  0xfe   :  { %v220_v9 = vpop.f32.mrb[5].mxu0  ;;  %717 = vmatprep.mubr.bf16.mxu1 %v1388_v4  ;;  %v460_v11 = vmul.f32 %v1280_v8, %v407_v58 }
  0xff   :  { %v1281_v10 = vpop.f32.mrb[6].mxu0  ;;  %v458_v14 = vmul.f32 %v397_v55, %v220_v9 }
 0x100   :  { %v461_v12 = vmul.f32 %v1281_v10, %v412_v60  ;;  %v223_v13 = vpop.f32.mrb[7].mxu0 }
 0x101   :  { %v459_v15 = vmul.f32 %v402_v56, %v223_v13 }
 0x102   :  { %v473_v17 = vpack.c.bf16 %v461_v12, %v460_v11 }
 0x103   :  { %v472_v20 = vpack.c.bf16 %v459_v15, %v458_v14 }
 0x105   :  { %v1284_v21 = vpop.f32.mrb[8].mxu0  ;;  %718 = vmatmul.mubr.bf16.gmra.mrb[4].mxu1 %v471_v3 }
 0x106   :  { %v236_v22 = vpop.f32.mrb[9].mxu0  ;;  %725 = vmatprep.mubr.bf16.mxu1 %v1389_v18  ;;  %v464_v25 = vmul.f32 %v1284_v21, %v427_v16 }
 0x107   :  { %v1285_v23 = vpop.f32.mrb[10].mxu0  ;;  %v462_v29 = vmul.f32 %v417_v6, %v236_v22 }
 0x108   :  { %v465_v26 = vmul.f32 %v1285_v23, %v432_v19  ;;  %v239_v27 = vpop.f32.mrb[11].mxu0 }
 0x109   :  { %v463_v30 = vmul.f32 %v422_v7, %v239_v27 }
 0x10a   :  { %v475_v31 = vpack.c.bf16 %v465_v26, %v464_v25 }
 0x10b   :  { %v474_v33 = vpack.c.bf16 %v463_v30, %v462_v29 }
 0x10d   :  { %v1288_v34 = vpop.f32.mrb[12].mxu0  ;;  %726 = vmatmul.mubr.bf16.gmra.mrb[8].mxu1 %v472_v20 }
 0x10e   :  { %v252_v36 = vpop.f32.mrb[13].mxu0  ;;  %733 = vmatprep.mubr.bf16.mxu1 %v1390_v32  ;;  %v468_v39 = vmul.f32 %v1288_v34, %v447_v35 }
 0x10f   :  { %v1289_v38 = vpop.f32.mrb[14].mxu0  ;;  %v466_v42 = vmul.f32 %v437_v24, %v252_v36 }
 0x110   :  { %v469_v40 = vmul.f32 %v1289_v38, %v452_v37  ;;  %v255_v41 = vpop.f32.mrb[15].mxu0 }
 0x111   :  { %v467_v43 = vmul.f32 %v442_v28, %v255_v41 }
 0x112   :  { %v477_v44 = vpack.c.bf16 %v469_v40, %v468_v39 }
 0x113   :  { %v476_v46 = vpack.c.bf16 %v467_v43, %v466_v42 }
 0x115   :  { %734 = vmatmul.mubr.bf16.gmra.mrb[12].mxu1 %v473_v17 }
 0x116   :  { %741 = vmatprep.mubr.bf16.mxu1 %v1391_v45 }
 0x11d   :  { %742 = vmatmul.mubr.bf16.gmra.mrb[16].mxu1 %v474_v33 }
 0x11e   :  { %749 = vmatprep.mubr.bf16.mxu1 %v1392_v47 }
 0x125   :  { %750 = vmatmul.mubr.bf16.gmra.mrb[20].mxu1 %v475_v31 }
 0x126   :  { %757 = vmatprep.mubr.bf16.mxu1 %v1393_v48 }
 0x12d   :  { %758 = vmatmul.mubr.bf16.gmra.mrb[24].mxu1 %v476_v46 }
 0x12e   :  { %765 = vmatprep.mubr.bf16.mxu1 %v1394_v49 }
 0x135   :  { %766 = vmatmul.mubr.bf16.gmra.mrb[28].mxu1 %v477_v44 }
 0x136   :  { %1346 = vmatprep.mubr.msk.bf16.mxu1 %vm1413_vm0, %v1412_v50 }
 0x1d0   :  { %v1183_v51 = vpop.f32.mrb[0].mxu1 }
 0x1d1   :  { %v1184_v53 = vpop.f32.mrb[1].mxu1 }
 0x1d2   :  { %v1185_v54 = vadd.f32 %v1184_v53, %v1183_v51  ;;  %v1186_v55 = vpop.f32.mrb[2].mxu1 }
 0x1d3   :  { %v1187_v56 = vpop.f32.mrb[3].mxu1 }
 0x1d4   :  { %v712_v57 = vadd.f32 %v1185_v54, %v1659_v52  ;;  %v1188_v58 = vadd.f32 %v1187_v56, %v1186_v55 }
 0x1d6   :  { %v715_v59 = vadd.f32 %v1188_v58, %v1659_v52  ;;  %v774_v60 = vmax.f32 %v712_v57, 0.0 }
 0x1d8   :  { %v775_v61 = vmax.f32 %v715_v59, 0.0  ;;  %v1189_v62 = vpop.f32.mrb[4].mxu1 }
 0x1d9   :  { %v1190_v63 = vpop.f32.mrb[5].mxu1 }
 0x1da   :  { %v791_v0 = vpack.c.bf16 %v775_v61, %v774_v60  ;;  %v1191_v1 = vadd.f32 %v1190_v63, %v1189_v62  ;;  %v1192_v2 = vpop.f32.mrb[6].mxu1 }
 0x1db   :  { %v1193_v3 = vpop.f32.mrb[7].mxu1 }
 0x1dc   :  { %v720_v4 = vadd.f32 %v1191_v1, %v1659_v52  ;;  %v1194_v5 = vadd.f32 %v1193_v3, %v1192_v2  ;;  %1291 = vmatpush3.bf16.msra.mxu0 %v791_v0 }
 0x1dd   :  { %1292 = vmatprep.subr.bf16.mxu0 %v1412_v50 }
 0x1de   :  { %v723_v6 = vadd.f32 %v1194_v5, %v1659_v52  ;;  %v776_v7 = vmax.f32 %v720_v4, 0.0 }
 0x1e0   :  { %v777_v8 = vmax.f32 %v723_v6, 0.0  ;;  %v1195_v9 = vpop.f32.mrb[8].mxu1 }
 0x1e1   :  { %v1196_v10 = vpop.f32.mrb[9].mxu1 }
 0x1e2   :  { %v792_v11 = vpack.c.bf16 %v777_v8, %v776_v7  ;;  %v1197_v12 = vadd.f32 %v1196_v10, %v1195_v9  ;;  %v1198_v13 = vpop.f32.mrb[10].mxu1 }
 0x1e3   :  { %v1199_v14 = vpop.f32.mrb[11].mxu1 }
 0x1e4   :  { %v728_v15 = vadd.f32 %v1197_v12, %v1659_v52  ;;  %v1200_v16 = vadd.f32 %v1199_v14, %v1198_v13  ;;  %1293 = vmatpush3.bf16.msra.mxu0 %v792_v11  ;;  %v790_v14 = vld [vmem:[%s1769_s6] sm:$0xf] }
 0x1e5   :  { %1294 = vmatprep.subr.bf16.mxu0 %v1412_v50 }
 0x1e6   :  { %v731_v17 = vadd.f32 %v1200_v16, %v1659_v52  ;;  %v778_v18 = vmax.f32 %v728_v15, 0.0  ;;  %v1395_v15 = vld [vmem:[%s1767_s8] sm:$0xff]   ;;  %v1397_v16 = vld [vmem:[%s1767_s8 + $0x10] sm:$0xff]  }
 0x1e8   :  { %v779_v19 = vmax.f32 %v731_v17, 0.0  ;;  %v1201_v20 = vpop.f32.mrb[12].mxu1  ;;  %v1398_v17 = vld [vmem:[%s1767_s8 + $0x18] sm:$0xff]  }
 0x1e9   :  { %v1202_v21 = vpop.f32.mrb[13].mxu1 }
 0x1ea   :  { %v793_v22 = vpack.c.bf16 %v779_v19, %v778_v18  ;;  %v1203_v23 = vadd.f32 %v1202_v21, %v1201_v20  ;;  %v1204_v24 = vpop.f32.mrb[14].mxu1  ;;  %v1399_v18 = vld [vmem:[%s1767_s8 + $0x20] sm:$0xff]   ;;  %v1400_v19 = vld [vmem:[%s1767_s8 + $0x28] sm:$0xff]   ;;  %v1401_v20 = vld [vmem:[%s1767_s8 + $0x30] sm:$0xff]  }
 0x1eb   :  { %v1205_v25 = vpop.f32.mrb[15].mxu1  ;;  %v1402_v21 = vld [vmem:[%s1767_s8 + $0x38] sm:$0xff]  }
 0x1ec   :  { %v736_v26 = vadd.f32 %v1203_v23, %v1659_v52  ;;  %v1206_v27 = vadd.f32 %v1205_v25, %v1204_v24  ;;  %1295 = vmatpush3.bf16.msra.mxu0 %v793_v22  ;;  %v1403_v22 = vld [vmem:[%s1770_s10] sm:$0xff]   ;;  %v1404_v23 = vld [vmem:[%s1770_s10 + $0x8] sm:$0xff]   ;;  %v1405_v24 = vld [vmem:[%s1770_s10 + $0x10] sm:$0xff]  }
 0x1ed   :  { %1296 = vmatprep.subr.bf16.mxu0 %v1412_v50  ;;  %1331 = vmatpush3.bf16.msra.mxu1 %v1403_v22  ;;  %v1406_v25 = vld [vmem:[%s1770_s10 + $0x18] sm:$0xff]  }
 0x1ee   :  { %v739_v28 = vadd.f32 %v1206_v27, %v1659_v52  ;;  %v780_v29 = vmax.f32 %v736_v26, 0.0  ;;  %1332 = vmatprep.subr.bf16.mxu1 %v1412_v50  ;;  %v1407_v26 = vld [vmem:[%s1770_s10 + $0x20] sm:$0xff]   ;;  %v1408_v27 = vld [vmem:[%s1770_s10 + $0x28] sm:$0xff]  }
 0x1f0   :  { %v781_v30 = vmax.f32 %v739_v28, 0.0  ;;  %v1207_v31 = vpop.f32.mrb[16].mxu1  ;;  %v1409_v28 = vld [vmem:[%s1770_s10 + $0x30] sm:$0xff]  }
 0x1f1   :  { %v1208_v32 = vpop.f32.mrb[17].mxu1  ;;  %1333 = vmatpush3.bf16.msra.mxu1 %v1404_v23 }
 0x1f2   :  { %v794_v33 = vpack.c.bf16 %v781_v30, %v780_v29  ;;  %v1209_v34 = vadd.f32 %v1208_v32, %v1207_v31  ;;  %v1210_v35 = vpop.f32.mrb[18].mxu1  ;;  %1334 = vmatprep.subr.bf16.mxu1 %v1412_v50  ;;  %v859_v29 = vpop.permute.xlu0 %858 }
 0x1f3   :  { %v1211_v36 = vpop.f32.mrb[19].mxu1 }
 0x1f4   :  { %v744_v37 = vadd.f32 %v1209_v34, %v1659_v52  ;;  %v1212_v38 = vadd.f32 %v1211_v36, %v1210_v35  ;;  %1297 = vmatpush3.bf16.msra.mxu0 %v794_v33  ;;  %v1410_v36 = vld [vmem:[%s1770_s10 + $0x38] sm:$0xff]  }
 0x1f5   :  { %1298 = vmatprep.subr.bf16.mxu0 %v1412_v50  ;;  %1335 = vmatpush3.bf16.msra.mxu1 %v1405_v24 }
 0x1f6   :  { %v747_v39 = vadd.f32 %v1212_v38, %v1659_v52  ;;  %v782_v40 = vmax.f32 %v744_v37, 0.0  ;;  %1336 = vmatprep.subr.bf16.mxu1 %v1412_v50  ;;  %v1133_v37 = vld [vmem:[%s1771_s9] ss:$0 sm:$0xff] }
 0x1f8   :  { %v783_v41 = vmax.f32 %v747_v39, 0.0  ;;  %v1213_v42 = vpop.f32.mrb[20].mxu1 }
 0x1f9   :  { %v1214_v43 = vpop.f32.mrb[21].mxu1  ;;  %1337 = vmatpush3.bf16.msra.mxu1 %v1406_v25 }
 0x1fa   :  { %v795_v44 = vpack.c.bf16 %v783_v41, %v782_v40  ;;  %v1215_v45 = vadd.f32 %v1214_v43, %v1213_v42  ;;  %v1216_v46 = vpop.f32.mrb[22].mxu1  ;;  %1338 = vmatprep.subr.bf16.mxu1 %v1412_v50 }
 0x1fb   :  { %v1217_v47 = vpop.f32.mrb[23].mxu1 }
 0x1fc   :  { %v752_v48 = vadd.f32 %v1215_v45, %v1659_v52  ;;  %v1218_v49 = vadd.f32 %v1217_v47, %v1216_v46  ;;  %1299 = vmatpush3.bf16.msra.mxu0 %v795_v44  ;;  %v1142_v44 = vld [vmem:[%s1772_s11] ss:$0 sm:$0xff] }
 0x1fd   :  { %1300 = vmatprep.subr.bf16.mxu0 %v1412_v50  ;;  %1339 = vmatpush3.bf16.msra.mxu1 %v1407_v26 }
 0x1fe   :  { %v755_v51 = vadd.f32 %v1218_v49, %v1659_v52  ;;  %v784_v53 = vmax.f32 %v752_v48, 0.0  ;;  %1340 = vmatprep.subr.bf16.mxu1 %v1412_v50 }
 0x200   :  { %v785_v54 = vmax.f32 %v755_v51, 0.0  ;;  %v1219_v55 = vpop.f32.mrb[24].mxu1 }
 0x201   :  { %v1220_v56 = vpop.f32.mrb[25].mxu1  ;;  %1341 = vmatpush3.bf16.msra.mxu1 %v1408_v27 }
 0x202   :  { %v796_v57 = vpack.c.bf16 %v785_v54, %v784_v53  ;;  %v1221_v58 = vadd.f32 %v1220_v56, %v1219_v55  ;;  %v1222_v59 = vpop.f32.mrb[26].mxu1  ;;  %1342 = vmatprep.subr.bf16.mxu1 %v1412_v50 }
 0x203   :  { %v1223_v60 = vpop.f32.mrb[27].mxu1 }
 0x204   :  { %v760_v61 = vadd.f32 %v1221_v58, %v1659_v52  ;;  %v1224_v62 = vadd.f32 %v1223_v60, %v1222_v59  ;;  %1301 = vmatpush3.bf16.msra.mxu0 %v796_v57 }
 0x205   :  { %1302 = vmatprep.subr.bf16.mxu0 %v1412_v50  ;;  %1343 = vmatpush3.bf16.msra.mxu1 %v1409_v28 }
 0x206   :  { %v763_v63 = vadd.f32 %v1224_v62, %v1659_v52  ;;  %v786_v0 = vmax.f32 %v760_v61, 0.0  ;;  %1344 = vmatprep.subr.bf16.mxu1 %v1412_v50 }
 0x208   :  { %v787_v1 = vmax.f32 %v763_v63, 0.0  ;;  %v1225_v2 = vpop.f32.mrb[28].mxu1 }
 0x209   :  { %v1226_v3 = vpop.f32.mrb[29].mxu1  ;;  %1345 = vmatpush3.bf16.msra.mxu1 %v1410_v36 }
 0x20a   :  { %v797_v4 = vpack.c.bf16 %v787_v1, %v786_v0  ;;  %v1227_v5 = vadd.f32 %v1226_v3, %v1225_v2  ;;  %v1228_v6 = vpop.f32.mrb[30].mxu1 }
 0x20b   :  { %v1229_v7 = vpop.f32.mrb[31].mxu1 }
 0x20c   :  { %v768_v8 = vadd.f32 %v1227_v5, %v1659_v52  ;;  %v1230_v9 = vadd.f32 %v1229_v7, %v1228_v6  ;;  %1303 = vmatpush3.bf16.msra.mxu0 %v797_v4 }
 0x20d   :  { %1304 = vmatprep.subr.bf16.mxu0 %v1412_v50 }
 0x20e   :  { %v771_v10 = vadd.f32 %v1230_v9, %v1659_v52  ;;  %v788_v11 = vmax.f32 %v768_v8, 0.0  ;;  %v1396_v52 = vld [vmem:[%s1767_s8 + $0x8] sm:$0xff]  }
 0x210   :  { %v789_v12 = vmax.f32 %v771_v10, 0.0 }
 0x212   :  { %v798_v13 = vpack.c.bf16 %v789_v12, %v788_v11 }
 0x214   :  { %1305 = vmatpush3.bf16.msra.mxu0 %v798_v13 }
 0x215   :  { %1310 = vmatprep.subr.bf16.mxu0 %v1412_v50 }
 0x217   :  { %1307 = vmatmul.mubr.bf16.vlgmr.msra.gmra.mrb[16].mxu0 %v790_v14 }
 0x218   :  { %1311 = vmatpush3.bf16.msra.mxu0 %v1395_v15  ;;  %1326 = vmatprep.mubr.msk.bf16.mxu0 %vm1413_vm0, %v1412_v50 }
 0x219   :  { %1312 = vmatprep.subr.bf16.mxu0 %v1412_v50 }
 0x21c   :  { %1313 = vmatpush3.bf16.msra.mxu0 %v1396_v52 }
 0x21d   :  { %1314 = vmatprep.subr.bf16.mxu0 %v1412_v50 }
 0x220   :  { %1315 = vmatpush3.bf16.msra.mxu0 %v1397_v16 }
 0x221   :  { %1316 = vmatprep.subr.bf16.mxu0 %v1412_v50 }
 0x224   :  { %1317 = vmatpush3.bf16.msra.mxu0 %v1398_v17 }
 0x225   :  { %1318 = vmatprep.subr.bf16.mxu0 %v1412_v50 }
 0x228   :  { %1319 = vmatpush3.bf16.msra.mxu0 %v1399_v18 }
 0x229   :  { %1320 = vmatprep.subr.bf16.mxu0 %v1412_v50 }
 0x22c   :  { %1321 = vmatpush3.bf16.msra.mxu0 %v1400_v19 }
 0x22d   :  { %1322 = vmatprep.subr.bf16.mxu0 %v1412_v50 }
 0x230   :  { %1323 = vmatpush3.bf16.msra.mxu0 %v1401_v20 }
 0x231   :  { %1324 = vmatprep.subr.bf16.mxu0 %v1412_v50 }
 0x234   :  { %1325 = vmatpush3.bf16.msra.mxu0 %v1402_v21 }
 0x2ea   :  { %v833_v30 = vpop.f32.mrb[16].mxu0 }
 0x2eb   :  { %v861_v31 = vmul.f32 %v859_v29, %v833_v30  ;;  %v1308_v32 = vpop.f32.mrb[17].mxu0 }
 0x2ec   :  { %v836_v33 = vpop.f32.mrb[18].mxu0 }
 0x2ed   :  { %v862_v34 = vpack.c.bf16 %v861_v31, %v861_v31  ;;  %v1309_v35 = vpop.f32.mrb[19].mxu0 }
 0x2ef   :  { %1327 = vmatmul.mubr.bf16.vlgmr.msra.gmra.mrb[20].mxu0 %v862_v34 }
 0x3c2   :  { %v968_v38 = vpop.f32.mrb[20].mxu0 }
 0x3c3   :  { %v969_v39 = vadd.f32 %v1133_v37, %v968_v38  ;;  %v1328_v50 = vpop.f32.mrb[21].mxu0 }
 0x3c4   :  { %v971_v40 = vpop.f32.mrb[22].mxu0 }
 0x3c5   :  { %v974_v41 = vmax.f32 %v969_v39, 0.0  ;;  %v1329_v42 = vpop.f32.mrb[23].mxu0 }
 0x3c7   :  { %v975_v43 = vpack.c.bf16 %v974_v41, %v974_v41 }
 0x3c9   :  { %1347 = vmatmul.mubr.bf16.vlgmr.msra.gmra.mrb[32].mxu1 %v975_v43 }
 0x49c   :  { %v1081_v45 = vpop.f32.mrb[32].mxu1 }
 0x49d   :  { %v1082_v46 = vadd.f32 %v1142_v44, %v1081_v45  ;;  %v1348_v47 = vpop.f32.mrb[33].mxu1 }
 0x49e   :  { %v1084_v48 = vpop.f32.mrb[34].mxu1 }
 0x49f   :  { %1087 = vst [vmem:[%s1773_s12] sm:$0xff] %v1082_v46  ;;  %v1349_v49 = vpop.f32.mrb[35].mxu1 }

</bundles_post_ra>
